<compile_context>
chip_gen: v5e
topology: v5e:2x2
jax: 0.10.0
libtpu: 0.0.40
codegen_flags: <defaults>
</compile_context>

<pallas_src>
import functools

import jax
import jax.numpy as jnp
from jax import lax
from jax.experimental import pallas as pl
from jax.experimental.pallas import tpu as pltpu

_LEAKY_SLOPE = 0.2
_VMEM_LIMIT = 32 * 1024 * 1024       # safe on v5e/v6e/v7x scoped defaults
# Set to jnp.bfloat16 on v6e/v7x once shapes are large enough to be MXU-bound
# (accumulation stays f32 via preferred_element_type).  f32 keeps the toy-shape
# numerics bit-tight and is wall-clock identical here.
_MATMUL_DTYPE = jnp.float32


def _leaky(x):
    return jnp.where(x >= 0.0, x, _LEAKY_SLOPE * x)


# --------------------------------------------------------------------------------------
# One dilated causal Conv1d (+LeakyReLU) on a batch-flattened (B*L, Cin) activation slab.
# Tap k (left shift s = (K-1-k)*dilation) contributes x[t-s] @ w[k] to output row t, zero
# for t < s.  The K shifted views are lane-concatenated into one (B*L, K*Cin) im2col
# operand -> ONE MXU matmul per layer; bias folded into the matmul result.
# --------------------------------------------------------------------------------------
def _causal_conv_layer(h, w_flat, b, *, dilation, K, L):
    BL, Cin = h.shape
    if K > 1:
        pad = (K - 1) * dilation
        t_in_row = lax.broadcasted_iota(jnp.int32, (BL, 1), 0) % L   # time index within row
        hp = jnp.concatenate([jnp.zeros((pad, Cin), jnp.float32), h], axis=0)
        views = []
        for k in range(K):
            shift = (K - 1 - k) * dilation
            if shift == 0:
                views.append(h)                                      # last tap: no shift/mask
            else:
                v = hp[k * dilation:k * dilation + BL, :]            # rows shifted left by `shift`
                views.append(jnp.where(t_in_row >= shift, v, 0.0))   # causal pad + batch isolation
        col = jnp.concatenate(views, axis=-1)                        # (B*L, K*Cin)
    else:
        col = h
    out = jnp.dot(col.astype(_MATMUL_DTYPE), w_flat.astype(_MATMUL_DTYPE),
                  preferred_element_type=jnp.float32) + b
    return _leaky(out)


# --------------------------------------------------------------------------------------
# Fully fused TDASAE forward kernel (single invocation, no grid, everything in VMEM).
# --------------------------------------------------------------------------------------
def _tdasae_kernel(x_ref, land_ref, *rest, enc_dils, dec_dils, K, B, L_enc, L_dec):
    n_enc, n_dec = len(enc_dils), len(dec_dils)
    refs = list(rest)
    out_ref = refs.pop()                                  # last positional ref is the output
    idx = 0
    enc_layers = [(refs[idx + 2 * i], refs[idx + 2 * i + 1]) for i in range(n_enc)]
    idx += 2 * n_enc
    fc_w, fc_b = refs[idx], refs[idx + 1]; idx += 2
    p1_w, p1_b = refs[idx], refs[idx + 1]; idx += 2
    p2w_code, p2w_land, p2_b = refs[idx], refs[idx + 1], refs[idx + 2]; idx += 3
    dec_layers = [(refs[idx + 2 * i], refs[idx + 2 * i + 1]) for i in range(n_dec)]

    # ---------------- ConvEncoder ----------------
    h = x_ref[...]                                        # (B*L_enc, emb), channels-last, f32
    for (w, b), d in zip(enc_layers, enc_dils):
        h = _causal_conv_layer(h, w[...], b[...], dilation=d, K=K, L=L_enc)

    # global max-pool over time per batch row (static B, aligned L_enc slices)
    hmax = jnp.concatenate(
        [jnp.max(h[bb * L_enc:(bb + 1) * L_enc, :], axis=0, keepdims=True) for bb in range(B)],
        axis=0)                                           # (B, C_enc_last)
    code = jnp.dot(hmax, fc_w[...], preferred_element_type=jnp.float32) + fc_b[...]

    # ---------------- StackDecoder head ----------------
    p1 = _leaky(jnp.dot(land_ref[...], p1_w[...], preferred_element_type=jnp.float32)
                + p1_b[...])
    # concat([code, p1], 1) @ W2 == code @ W2[:Cc] + p1 @ W2[Cc:]  (weights pre-split in wrapper)
    h0 = _leaky(jnp.dot(code, p2w_code[...], preferred_element_type=jnp.float32)
                + jnp.dot(p1, p2w_land[...], preferred_element_type=jnp.float32)
                + p2_b[...])                              # (B, C0)

    # broadcast along decoder time; stays in VMEM/vregs, never written to HBM
    C0 = h0.shape[1]
    h = jnp.concatenate(
        [jnp.broadcast_to(h0[bb:bb + 1, :], (L_dec, C0)) for bb in range(B)], axis=0)

    # ---------------- decoder conv stack ----------------
    for (w, b), d in zip(dec_layers, dec_dils):
        h = _causal_conv_layer(h, w[...], b[...], dilation=d, K=K, L=L_dec)

    out_ref[...] = h.astype(out_ref.dtype)                # (B*L_dec, emb)


# --------------------------------------------------------------------------------------
# Wrapper: lays arguments out for the fused kernel (channels-last, batch-flattened input,
# taps-flattened conv weights, pre-split proj2 weight) and undoes the layout at the end.
# --------------------------------------------------------------------------------------
def tdasae_forward(X, landscape, params, *, seq_length):
    """X: (B, emb, L) f32, landscape: (B, *shape) f32 -> (B, emb, seq_length) f32."""
    B, emb, L = X.shape
    K = params["enc_conv"][0]["w"].shape[0]
    n_enc = len(params["enc_conv"])
    n_dec = len(params["dec_conv"])
    enc_dils = tuple(2 ** i for i in range(n_enc))
    dec_dils = tuple(2 ** i for i in range(n_dec))
    code_size = params["fc_w"].shape[1]

    x2 = jnp.transpose(X, (0, 2, 1)).reshape(B * L, emb)          # channels-last, batch-flattened
    land_flat = landscape.reshape(B, -1)

    args = [x2, land_flat]
    for lyr in params["enc_conv"]:
        k_, cin, cout = lyr["w"].shape
        args += [lyr["w"].reshape(k_ * cin, cout), lyr["b"]]
    args += [params["fc_w"], params["fc_b"],
             params["p1_w"], params["p1_b"],
             params["p2_w"][:code_size, :], params["p2_w"][code_size:, :], params["p2_b"]]
    for lyr in params["dec_conv"]:
        k_, cin, cout = lyr["w"].shape
        args += [lyr["w"].reshape(k_ * cin, cout), lyr["b"]]

    kernel = functools.partial(_tdasae_kernel, enc_dils=enc_dils, dec_dils=dec_dils,
                               K=K, B=B, L_enc=L, L_dec=seq_length)
    vmem = pl.BlockSpec(memory_space=pltpu.MemorySpace.VMEM)

    out_flat = pl.pallas_call(
        kernel,
        out_shape=jax.ShapeDtypeStruct((B * seq_length, emb), jnp.float32),
        in_specs=[vmem] * len(args),
        out_specs=vmem,
        compiler_params=pltpu.CompilerParams(vmem_limit_bytes=_VMEM_LIMIT),
    )(*args)

    return jnp.transpose(out_flat.reshape(B, seq_length, emb), (0, 2, 1))


# ---------------------------------- pure-JAX reference ----------------------------------
def _dc_conv_ref(x, w, b, dilation):
    B, L, Cin = x.shape
    K, _, Cout = w.shape
    pad = (K - 1) * dilation
    xp = jnp.pad(x, ((0, 0), (pad, 0), (0, 0)))
    acc = jnp.zeros((B, L, Cout), jnp.float32) + b
    for k in range(K):
        acc = acc + jnp.einsum("blc,cd->bld", xp[:, k * dilation:k * dilation + L, :], w[k])
    return jnp.where(acc >= 0.0, acc, _LEAKY_SLOPE * acc)


def _reference(X, landscape, params, *, seq_length):
    B = X.shape[0]
    h = jnp.transpose(X, (0, 2, 1))
    for i, lyr in enumerate(params["enc_conv"]):
        h = _dc_conv_ref(h, lyr["w"], lyr["b"], 2 ** i)
    code = h.max(axis=1) @ params["fc_w"] + params["fc_b"]

    p1 = landscape.reshape(B, -1) @ params["p1_w"] + params["p1_b"]
    p1 = jnp.where(p1 >= 0.0, p1, _LEAKY_SLOPE * p1)
    hcat = jnp.concatenate([code, p1], axis=1)
    p2 = hcat @ params["p2_w"] + params["p2_b"]
    p2 = jnp.where(p2 >= 0.0, p2, _LEAKY_SLOPE * p2)

    h = jnp.broadcast_to(p2[:, None, :], (B, seq_length, p2.shape[1]))
    for i, lyr in enumerate(params["dec_conv"]):
        h = _dc_conv_ref(h, lyr["w"], lyr["b"], 2 ** i)
    return jnp.transpose(h, (0, 2, 1))


# ------------------------------------ init helpers --------------------------------------
def _init_params(key, *, emb_size, code_size, channels, kernel_size, shape):
    enc_ch = [emb_size] + list(channels)                 # ConvEncoder: insert emb at front
    dec_ch = list(channels[::-1]) + [emb_size]           # StackDecoder: reversed + emb appended
    flat = 1
    for s in shape:
        flat *= s

    keys = iter(jax.random.split(key, 64))

    def unif(shp, fan_in):
        s = 1.0 / jnp.sqrt(jnp.float32(fan_in))
        return jax.random.uniform(next(keys), shp, jnp.float32, -s, s)

    def conv_stack(chs):
        return [
            {"w": unif((kernel_size, chs[i], chs[i + 1]), chs[i] * kernel_size),
             "b": unif((1, chs[i + 1]), chs[i] * kernel_size)}
            for i in range(len(chs) - 1)
        ]

    return {
        "enc_conv": conv_stack(enc_ch),
        "fc_w": unif((enc_ch[-1], code_size), enc_ch[-1]),
        "fc_b": unif((1, code_size), enc_ch[-1]),
        "p1_w": unif((flat, code_size), flat),
        "p1_b": unif((1, code_size), flat),
        "p2_w": unif((2 * code_size, dec_ch[0]), 2 * code_size),
        "p2_b": unif((1, dec_ch[0]), 2 * code_size),
        "dec_conv": conv_stack(dec_ch),
    }


if __name__ == "__main__":
    # Small shapes consistent with the module (L / seq_length kept multiples of 8).
    batch = 2
    emb_size = 8
    code_size = 32
    seq_len_in = 16        # encoder input length
    seq_length = 16        # decoder output length
    channels = [8, 12, 16]
    kernel_size = 4
    shape = (3, 4, 8)      # landscape: (feature_level, num_layers, n_bins)

    root = jax.random.PRNGKey(0)
    kx, kl, kp = jax.random.split(root, 3)
    X = jax.random.normal(kx, (batch, emb_size, seq_len_in), jnp.float32)
    landscape = jax.random.normal(kl, (batch,) + shape, jnp.float32)
    params = _init_params(kp, emb_size=emb_size, code_size=code_size,
                          channels=channels, kernel_size=kernel_size, shape=shape)

    out = tdasae_forward(X, landscape, params, seq_length=seq_length)
    out = jax.block_until_ready(out)

    ref = jax.block_until_ready(_reference(X, landscape, params, seq_length=seq_length))

    assert out.shape == (batch, emb_size, seq_length)
    assert bool(jnp.all(jnp.isfinite(out)))
    assert jnp.allclose(out, ref, rtol=2e-2, atol=2e-2), "mismatch vs JAX reference"

    print("KERNEL_OK")
</pallas_src>

<mosaic_0001>
module attributes {stable_mosaic.version = 11 : i64} {
  func.func @_tdasae_kernel(%arg0: memref<32x8xf32, #tpu.memory_space<vmem>>, %arg1: memref<2x96xf32, #tpu.memory_space<vmem>>, %arg2: memref<32x8xf32, #tpu.memory_space<vmem>>, %arg3: memref<1x8xf32, #tpu.memory_space<vmem>>, %arg4: memref<32x12xf32, #tpu.memory_space<vmem>>, %arg5: memref<1x12xf32, #tpu.memory_space<vmem>>, %arg6: memref<48x16xf32, #tpu.memory_space<vmem>>, %arg7: memref<1x16xf32, #tpu.memory_space<vmem>>, %arg8: memref<16x32xf32, #tpu.memory_space<vmem>>, %arg9: memref<1x32xf32, #tpu.memory_space<vmem>>, %arg10: memref<96x32xf32, #tpu.memory_space<vmem>>, %arg11: memref<1x32xf32, #tpu.memory_space<vmem>>, %arg12: memref<32x16xf32, #tpu.memory_space<vmem>>, %arg13: memref<32x16xf32, #tpu.memory_space<vmem>>, %arg14: memref<1x16xf32, #tpu.memory_space<vmem>>, %arg15: memref<64x12xf32, #tpu.memory_space<vmem>>, %arg16: memref<1x12xf32, #tpu.memory_space<vmem>>, %arg17: memref<48x8xf32, #tpu.memory_space<vmem>>, %arg18: memref<1x8xf32, #tpu.memory_space<vmem>>, %arg19: memref<32x8xf32, #tpu.memory_space<vmem>>, %arg20: memref<1x8xf32, #tpu.memory_space<vmem>>, %arg21: memref<32x8xf32, #tpu.memory_space<vmem>>) attributes {dimension_semantics = [], scalar_prefetch = 0 : i64, scratch_operands = 0 : i64, tpu.core_type = #tpu.core_type<tc>} {
    %c0 = arith.constant 0 : index
    %c0_0 = arith.constant 0 : index
    %0 = vector.load %arg0[%c0, %c0_0] : memref<32x8xf32, #tpu.memory_space<vmem>>, vector<32x8xf32>
    %c0_1 = arith.constant 0 : index
    %c0_2 = arith.constant 0 : index
    %1 = vector.load %arg2[%c0_1, %c0_2] : memref<32x8xf32, #tpu.memory_space<vmem>>, vector<32x8xf32>
    %c0_3 = arith.constant 0 : index
    %c0_4 = arith.constant 0 : index
    %2 = vector.load %arg3[%c0_3, %c0_4] : memref<1x8xf32, #tpu.memory_space<vmem>>, vector<1x8xf32>
    %3 = tpu.iota {dimensions = array<i32: 0>} : vector<32x1xi32>
    %c16_i32 = arith.constant 16 : i32
    %c0_i32 = arith.constant 0 : i32
    %4 = arith.cmpi eq, %c16_i32, %c0_i32 : i32
    %c1_i32 = arith.constant 1 : i32
    %5 = arith.select %4, %c1_i32, %c16_i32 : i32
    %6 = vector.broadcast %5 : i32 to vector<32x1xi32>
    %7 = arith.remsi %3, %6 : vector<32x1xi32>
    %c0_i32_5 = arith.constant 0 : i32
    %8 = vector.broadcast %c0_i32_5 : i32 to vector<32x1xi32>
    %9 = arith.cmpi ne, %7, %8 : vector<32x1xi32>
    %c0_i32_6 = arith.constant 0 : i32
    %10 = vector.broadcast %c0_i32_6 : i32 to vector<32x1xi32>
    %11 = arith.cmpi slt, %7, %10 : vector<32x1xi32>
    %c0_i32_7 = arith.constant 0 : i32
    %12 = arith.cmpi slt, %5, %c0_i32_7 : i32
    %13 = vector.broadcast %12 : i1 to vector<32x1xi1>
    %14 = vector.broadcast %13 : vector<32x1xi1> to vector<32x1xi1>
    %15 = arith.xori %11, %14 : vector<32x1xi1>
    %16 = arith.andi %15, %9 : vector<32x1xi1>
    %17 = vector.broadcast %5 : i32 to vector<32x1xi32>
    %18 = arith.addi %7, %17 : vector<32x1xi32>
    %19 = arith.select %16, %18, %7 : vector<32x1xi1>, vector<32x1xi32>
    %cst = arith.constant 0.000000e+00 : f32
    %20 = vector.broadcast %cst : f32 to vector<3x8xf32>
    %21 = tpu.concatenate %20, %0 in 0 : vector<3x8xf32>, vector<32x8xf32> -> vector<35x8xf32>
    %22 = vector.extract_strided_slice %21 {offsets = [0, 0], sizes = [32, 8], strides = [1, 1]} : vector<35x8xf32> to vector<32x8xf32>
    %c3_i32 = arith.constant 3 : i32
    %23 = vector.broadcast %c3_i32 : i32 to vector<32x1xi32>
    %24 = arith.cmpi sge, %19, %23 : vector<32x1xi32>
    %cst_8 = arith.constant 0.000000e+00 : f32
    %25 = vector.shape_cast %24 : vector<32x1xi1> to vector<32x1xi1>
    %26 = vector.broadcast %25 : vector<32x1xi1> to vector<32x8xi1>
    %27 = vector.broadcast %cst_8 : f32 to vector<32x8xf32>
    %28 = arith.select %26, %22, %27 : vector<32x8xi1>, vector<32x8xf32>
    %29 = vector.extract_strided_slice %21 {offsets = [1, 0], sizes = [32, 8], strides = [1, 1]} : vector<35x8xf32> to vector<32x8xf32>
    %c2_i32 = arith.constant 2 : i32
    %30 = vector.broadcast %c2_i32 : i32 to vector<32x1xi32>
    %31 = arith.cmpi sge, %19, %30 : vector<32x1xi32>
    %cst_9 = arith.constant 0.000000e+00 : f32
    %32 = vector.shape_cast %31 : vector<32x1xi1> to vector<32x1xi1>
    %33 = vector.broadcast %32 : vector<32x1xi1> to vector<32x8xi1>
    %34 = vector.broadcast %cst_9 : f32 to vector<32x8xf32>
    %35 = arith.select %33, %29, %34 : vector<32x8xi1>, vector<32x8xf32>
    %36 = vector.extract_strided_slice %21 {offsets = [2, 0], sizes = [32, 8], strides = [1, 1]} : vector<35x8xf32> to vector<32x8xf32>
    %c1_i32_10 = arith.constant 1 : i32
    %37 = vector.broadcast %c1_i32_10 : i32 to vector<32x1xi32>
    %38 = arith.cmpi sge, %19, %37 : vector<32x1xi32>
    %cst_11 = arith.constant 0.000000e+00 : f32
    %39 = vector.shape_cast %38 : vector<32x1xi1> to vector<32x1xi1>
    %40 = vector.broadcast %39 : vector<32x1xi1> to vector<32x8xi1>
    %41 = vector.broadcast %cst_11 : f32 to vector<32x8xf32>
    %42 = arith.select %40, %36, %41 : vector<32x8xi1>, vector<32x8xf32>
    %43 = tpu.concatenate %28, %35, %42, %0 in 1 : vector<32x8xf32>, vector<32x8xf32>, vector<32x8xf32>, vector<32x8xf32> -> vector<32x32xf32>
    %cst_12 = arith.constant dense<0.000000e+00> : vector<32x8xf32>
    %44 = tpu.matmul %43, %1, %cst_12 {dimension_numbers = #tpu.dot_dimension_numbers<[1], [0], [0], [1], [0, 0, 1, 1], [], []>} : vector<32x32xf32>, vector<32x8xf32>, vector<32x8xf32> -> vector<32x8xf32>
    %45 = vector.broadcast %2 : vector<1x8xf32> to vector<32x8xf32>
    %46 = arith.addf %44, %45 : vector<32x8xf32>
    %cst_13 = arith.constant 0.000000e+00 : f32
    %47 = vector.broadcast %cst_13 : f32 to vector<32x8xf32>
    %48 = arith.cmpf oge, %46, %47 : vector<32x8xf32>
    %cst_14 = arith.constant 2.000000e-01 : f32
    %49 = vector.broadcast %cst_14 : f32 to vector<32x8xf32>
    %50 = arith.mulf %49, %46 : vector<32x8xf32>
    %51 = arith.select %48, %46, %50 : vector<32x8xi1>, vector<32x8xf32>
    %c0_15 = arith.constant 0 : index
    %c0_16 = arith.constant 0 : index
    %52 = vector.load %arg4[%c0_15, %c0_16] : memref<32x12xf32, #tpu.memory_space<vmem>>, vector<32x12xf32>
    %c0_17 = arith.constant 0 : index
    %c0_18 = arith.constant 0 : index
    %53 = vector.load %arg5[%c0_17, %c0_18] : memref<1x12xf32, #tpu.memory_space<vmem>>, vector<1x12xf32>
    %54 = tpu.iota {dimensions = array<i32: 0>} : vector<32x1xi32>
    %c16_i32_19 = arith.constant 16 : i32
    %c0_i32_20 = arith.constant 0 : i32
    %55 = arith.cmpi eq, %c16_i32_19, %c0_i32_20 : i32
    %c1_i32_21 = arith.constant 1 : i32
    %56 = arith.select %55, %c1_i32_21, %c16_i32_19 : i32
    %57 = vector.broadcast %56 : i32 to vector<32x1xi32>
    %58 = arith.remsi %54, %57 : vector<32x1xi32>
    %c0_i32_22 = arith.constant 0 : i32
    %59 = vector.broadcast %c0_i32_22 : i32 to vector<32x1xi32>
    %60 = arith.cmpi ne, %58, %59 : vector<32x1xi32>
    %c0_i32_23 = arith.constant 0 : i32
    %61 = vector.broadcast %c0_i32_23 : i32 to vector<32x1xi32>
    %62 = arith.cmpi slt, %58, %61 : vector<32x1xi32>
    %c0_i32_24 = arith.constant 0 : i32
    %63 = arith.cmpi slt, %56, %c0_i32_24 : i32
    %64 = vector.broadcast %63 : i1 to vector<32x1xi1>
    %65 = vector.broadcast %64 : vector<32x1xi1> to vector<32x1xi1>
    %66 = arith.xori %62, %65 : vector<32x1xi1>
    %67 = arith.andi %66, %60 : vector<32x1xi1>
    %68 = vector.broadcast %56 : i32 to vector<32x1xi32>
    %69 = arith.addi %58, %68 : vector<32x1xi32>
    %70 = arith.select %67, %69, %58 : vector<32x1xi1>, vector<32x1xi32>
    %cst_25 = arith.constant 0.000000e+00 : f32
    %71 = vector.broadcast %cst_25 : f32 to vector<6x8xf32>
    %72 = tpu.concatenate %71, %51 in 0 : vector<6x8xf32>, vector<32x8xf32> -> vector<38x8xf32>
    %73 = vector.extract_strided_slice %72 {offsets = [0, 0], sizes = [32, 8], strides = [1, 1]} : vector<38x8xf32> to vector<32x8xf32>
    %c6_i32 = arith.constant 6 : i32
    %74 = vector.broadcast %c6_i32 : i32 to vector<32x1xi32>
    %75 = arith.cmpi sge, %70, %74 : vector<32x1xi32>
    %cst_26 = arith.constant 0.000000e+00 : f32
    %76 = vector.shape_cast %75 : vector<32x1xi1> to vector<32x1xi1>
    %77 = vector.broadcast %76 : vector<32x1xi1> to vector<32x8xi1>
    %78 = vector.broadcast %cst_26 : f32 to vector<32x8xf32>
    %79 = arith.select %77, %73, %78 : vector<32x8xi1>, vector<32x8xf32>
    %80 = vector.extract_strided_slice %72 {offsets = [2, 0], sizes = [32, 8], strides = [1, 1]} : vector<38x8xf32> to vector<32x8xf32>
    %c4_i32 = arith.constant 4 : i32
    %81 = vector.broadcast %c4_i32 : i32 to vector<32x1xi32>
    %82 = arith.cmpi sge, %70, %81 : vector<32x1xi32>
    %cst_27 = arith.constant 0.000000e+00 : f32
    %83 = vector.shape_cast %82 : vector<32x1xi1> to vector<32x1xi1>
    %84 = vector.broadcast %83 : vector<32x1xi1> to vector<32x8xi1>
    %85 = vector.broadcast %cst_27 : f32 to vector<32x8xf32>
    %86 = arith.select %84, %80, %85 : vector<32x8xi1>, vector<32x8xf32>
    %87 = vector.extract_strided_slice %72 {offsets = [4, 0], sizes = [32, 8], strides = [1, 1]} : vector<38x8xf32> to vector<32x8xf32>
    %c2_i32_28 = arith.constant 2 : i32
    %88 = vector.broadcast %c2_i32_28 : i32 to vector<32x1xi32>
    %89 = arith.cmpi sge, %70, %88 : vector<32x1xi32>
    %cst_29 = arith.constant 0.000000e+00 : f32
    %90 = vector.shape_cast %89 : vector<32x1xi1> to vector<32x1xi1>
    %91 = vector.broadcast %90 : vector<32x1xi1> to vector<32x8xi1>
    %92 = vector.broadcast %cst_29 : f32 to vector<32x8xf32>
    %93 = arith.select %91, %87, %92 : vector<32x8xi1>, vector<32x8xf32>
    %94 = tpu.concatenate %79, %86, %93, %51 in 1 : vector<32x8xf32>, vector<32x8xf32>, vector<32x8xf32>, vector<32x8xf32> -> vector<32x32xf32>
    %cst_30 = arith.constant dense<0.000000e+00> : vector<32x12xf32>
    %95 = tpu.matmul %94, %52, %cst_30 {dimension_numbers = #tpu.dot_dimension_numbers<[1], [0], [0], [1], [0, 0, 1, 1], [], []>} : vector<32x32xf32>, vector<32x12xf32>, vector<32x12xf32> -> vector<32x12xf32>
    %96 = vector.broadcast %53 : vector<1x12xf32> to vector<32x12xf32>
    %97 = arith.addf %95, %96 : vector<32x12xf32>
    %cst_31 = arith.constant 0.000000e+00 : f32
    %98 = vector.broadcast %cst_31 : f32 to vector<32x12xf32>
    %99 = arith.cmpf oge, %97, %98 : vector<32x12xf32>
    %cst_32 = arith.constant 2.000000e-01 : f32
    %100 = vector.broadcast %cst_32 : f32 to vector<32x12xf32>
    %101 = arith.mulf %100, %97 : vector<32x12xf32>
    %102 = arith.select %99, %97, %101 : vector<32x12xi1>, vector<32x12xf32>
    %c0_33 = arith.constant 0 : index
    %c0_34 = arith.constant 0 : index
    %103 = vector.load %arg6[%c0_33, %c0_34] : memref<48x16xf32, #tpu.memory_space<vmem>>, vector<48x16xf32>
    %c0_35 = arith.constant 0 : index
    %c0_36 = arith.constant 0 : index
    %104 = vector.load %arg7[%c0_35, %c0_36] : memref<1x16xf32, #tpu.memory_space<vmem>>, vector<1x16xf32>
    %105 = tpu.iota {dimensions = array<i32: 0>} : vector<32x1xi32>
    %c16_i32_37 = arith.constant 16 : i32
    %c0_i32_38 = arith.constant 0 : i32
    %106 = arith.cmpi eq, %c16_i32_37, %c0_i32_38 : i32
    %c1_i32_39 = arith.constant 1 : i32
    %107 = arith.select %106, %c1_i32_39, %c16_i32_37 : i32
    %108 = vector.broadcast %107 : i32 to vector<32x1xi32>
    %109 = arith.remsi %105, %108 : vector<32x1xi32>
    %c0_i32_40 = arith.constant 0 : i32
    %110 = vector.broadcast %c0_i32_40 : i32 to vector<32x1xi32>
    %111 = arith.cmpi ne, %109, %110 : vector<32x1xi32>
    %c0_i32_41 = arith.constant 0 : i32
    %112 = vector.broadcast %c0_i32_41 : i32 to vector<32x1xi32>
    %113 = arith.cmpi slt, %109, %112 : vector<32x1xi32>
    %c0_i32_42 = arith.constant 0 : i32
    %114 = arith.cmpi slt, %107, %c0_i32_42 : i32
    %115 = vector.broadcast %114 : i1 to vector<32x1xi1>
    %116 = vector.broadcast %115 : vector<32x1xi1> to vector<32x1xi1>
    %117 = arith.xori %113, %116 : vector<32x1xi1>
    %118 = arith.andi %117, %111 : vector<32x1xi1>
    %119 = vector.broadcast %107 : i32 to vector<32x1xi32>
    %120 = arith.addi %109, %119 : vector<32x1xi32>
    %121 = arith.select %118, %120, %109 : vector<32x1xi1>, vector<32x1xi32>
    %cst_43 = arith.constant 0.000000e+00 : f32
    %122 = vector.broadcast %cst_43 : f32 to vector<12x12xf32>
    %123 = tpu.concatenate %122, %102 in 0 : vector<12x12xf32>, vector<32x12xf32> -> vector<44x12xf32>
    %124 = vector.extract_strided_slice %123 {offsets = [0, 0], sizes = [32, 12], strides = [1, 1]} : vector<44x12xf32> to vector<32x12xf32>
    %c12_i32 = arith.constant 12 : i32
    %125 = vector.broadcast %c12_i32 : i32 to vector<32x1xi32>
    %126 = arith.cmpi sge, %121, %125 : vector<32x1xi32>
    %cst_44 = arith.constant 0.000000e+00 : f32
    %127 = vector.shape_cast %126 : vector<32x1xi1> to vector<32x1xi1>
    %128 = vector.broadcast %127 : vector<32x1xi1> to vector<32x12xi1>
    %129 = vector.broadcast %cst_44 : f32 to vector<32x12xf32>
    %130 = arith.select %128, %124, %129 : vector<32x12xi1>, vector<32x12xf32>
    %131 = vector.extract_strided_slice %123 {offsets = [4, 0], sizes = [32, 12], strides = [1, 1]} : vector<44x12xf32> to vector<32x12xf32>
    %c8_i32 = arith.constant 8 : i32
    %132 = vector.broadcast %c8_i32 : i32 to vector<32x1xi32>
    %133 = arith.cmpi sge, %121, %132 : vector<32x1xi32>
    %cst_45 = arith.constant 0.000000e+00 : f32
    %134 = vector.shape_cast %133 : vector<32x1xi1> to vector<32x1xi1>
    %135 = vector.broadcast %134 : vector<32x1xi1> to vector<32x12xi1>
    %136 = vector.broadcast %cst_45 : f32 to vector<32x12xf32>
    %137 = arith.select %135, %131, %136 : vector<32x12xi1>, vector<32x12xf32>
    %138 = vector.extract_strided_slice %123 {offsets = [8, 0], sizes = [32, 12], strides = [1, 1]} : vector<44x12xf32> to vector<32x12xf32>
    %c4_i32_46 = arith.constant 4 : i32
    %139 = vector.broadcast %c4_i32_46 : i32 to vector<32x1xi32>
    %140 = arith.cmpi sge, %121, %139 : vector<32x1xi32>
    %cst_47 = arith.constant 0.000000e+00 : f32
    %141 = vector.shape_cast %140 : vector<32x1xi1> to vector<32x1xi1>
    %142 = vector.broadcast %141 : vector<32x1xi1> to vector<32x12xi1>
    %143 = vector.broadcast %cst_47 : f32 to vector<32x12xf32>
    %144 = arith.select %142, %138, %143 : vector<32x12xi1>, vector<32x12xf32>
    %145 = tpu.concatenate %130, %137, %144, %102 in 1 : vector<32x12xf32>, vector<32x12xf32>, vector<32x12xf32>, vector<32x12xf32> -> vector<32x48xf32>
    %cst_48 = arith.constant dense<0.000000e+00> : vector<32x16xf32>
    %146 = tpu.matmul %145, %103, %cst_48 {dimension_numbers = #tpu.dot_dimension_numbers<[1], [0], [0], [1], [0, 0, 1, 1], [], []>} : vector<32x48xf32>, vector<48x16xf32>, vector<32x16xf32> -> vector<32x16xf32>
    %147 = vector.broadcast %104 : vector<1x16xf32> to vector<32x16xf32>
    %148 = arith.addf %146, %147 : vector<32x16xf32>
    %cst_49 = arith.constant 0.000000e+00 : f32
    %149 = vector.broadcast %cst_49 : f32 to vector<32x16xf32>
    %150 = arith.cmpf oge, %148, %149 : vector<32x16xf32>
    %cst_50 = arith.constant 2.000000e-01 : f32
    %151 = vector.broadcast %cst_50 : f32 to vector<32x16xf32>
    %152 = arith.mulf %151, %148 : vector<32x16xf32>
    %153 = arith.select %150, %148, %152 : vector<32x16xi1>, vector<32x16xf32>
    %154 = vector.extract_strided_slice %153 {offsets = [0, 0], sizes = [16, 16], strides = [1, 1]} : vector<32x16xf32> to vector<16x16xf32>
    %cst_51 = arith.constant dense<0xFF800000> : vector<16xf32>
    %155 = vector.multi_reduction <maximumf>, %154, %cst_51 [0] : vector<16x16xf32> to vector<16xf32>
    %156 = vector.shape_cast %155 : vector<16xf32> to vector<1x16xf32>
    %157 = vector.extract_strided_slice %153 {offsets = [16, 0], sizes = [16, 16], strides = [1, 1]} : vector<32x16xf32> to vector<16x16xf32>
    %cst_52 = arith.constant dense<0xFF800000> : vector<16xf32>
    %158 = vector.multi_reduction <maximumf>, %157, %cst_52 [0] : vector<16x16xf32> to vector<16xf32>
    %159 = vector.shape_cast %158 : vector<16xf32> to vector<1x16xf32>
    %160 = tpu.concatenate %156, %159 in 0 : vector<1x16xf32>, vector<1x16xf32> -> vector<2x16xf32>
    %c0_53 = arith.constant 0 : index
    %c0_54 = arith.constant 0 : index
    %161 = vector.load %arg8[%c0_53, %c0_54] : memref<16x32xf32, #tpu.memory_space<vmem>>, vector<16x32xf32>
    %cst_55 = arith.constant dense<0.000000e+00> : vector<2x32xf32>
    %162 = tpu.matmul %160, %161, %cst_55 {dimension_numbers = #tpu.dot_dimension_numbers<[1], [0], [0], [1], [0, 0, 1, 1], [], []>} : vector<2x16xf32>, vector<16x32xf32>, vector<2x32xf32> -> vector<2x32xf32>
    %c0_56 = arith.constant 0 : index
    %c0_57 = arith.constant 0 : index
    %163 = vector.load %arg9[%c0_56, %c0_57] : memref<1x32xf32, #tpu.memory_space<vmem>>, vector<1x32xf32>
    %164 = vector.broadcast %163 : vector<1x32xf32> to vector<2x32xf32>
    %165 = arith.addf %162, %164 : vector<2x32xf32>
    %c0_58 = arith.constant 0 : index
    %c0_59 = arith.constant 0 : index
    %166 = vector.load %arg1[%c0_58, %c0_59] : memref<2x96xf32, #tpu.memory_space<vmem>>, vector<2x96xf32>
    %c0_60 = arith.constant 0 : index
    %c0_61 = arith.constant 0 : index
    %167 = vector.load %arg10[%c0_60, %c0_61] : memref<96x32xf32, #tpu.memory_space<vmem>>, vector<96x32xf32>
    %cst_62 = arith.constant dense<0.000000e+00> : vector<2x32xf32>
    %168 = tpu.matmul %166, %167, %cst_62 {dimension_numbers = #tpu.dot_dimension_numbers<[1], [0], [0], [1], [0, 0, 1, 1], [], []>} : vector<2x96xf32>, vector<96x32xf32>, vector<2x32xf32> -> vector<2x32xf32>
    %c0_63 = arith.constant 0 : index
    %c0_64 = arith.constant 0 : index
    %169 = vector.load %arg11[%c0_63, %c0_64] : memref<1x32xf32, #tpu.memory_space<vmem>>, vector<1x32xf32>
    %170 = vector.broadcast %169 : vector<1x32xf32> to vector<2x32xf32>
    %171 = arith.addf %168, %170 : vector<2x32xf32>
    %cst_65 = arith.constant 0.000000e+00 : f32
    %172 = vector.broadcast %cst_65 : f32 to vector<2x32xf32>
    %173 = arith.cmpf oge, %171, %172 : vector<2x32xf32>
    %cst_66 = arith.constant 2.000000e-01 : f32
    %174 = vector.broadcast %cst_66 : f32 to vector<2x32xf32>
    %175 = arith.mulf %174, %171 : vector<2x32xf32>
    %176 = arith.select %173, %171, %175 : vector<2x32xi1>, vector<2x32xf32>
    %c0_67 = arith.constant 0 : index
    %c0_68 = arith.constant 0 : index
    %177 = vector.load %arg12[%c0_67, %c0_68] : memref<32x16xf32, #tpu.memory_space<vmem>>, vector<32x16xf32>
    %cst_69 = arith.constant dense<0.000000e+00> : vector<2x16xf32>
    %178 = tpu.matmul %165, %177, %cst_69 {dimension_numbers = #tpu.dot_dimension_numbers<[1], [0], [0], [1], [0, 0, 1, 1], [], []>} : vector<2x32xf32>, vector<32x16xf32>, vector<2x16xf32> -> vector<2x16xf32>
    %c0_70 = arith.constant 0 : index
    %c0_71 = arith.constant 0 : index
    %179 = vector.load %arg13[%c0_70, %c0_71] : memref<32x16xf32, #tpu.memory_space<vmem>>, vector<32x16xf32>
    %cst_72 = arith.constant dense<0.000000e+00> : vector<2x16xf32>
    %180 = tpu.matmul %176, %179, %cst_72 {dimension_numbers = #tpu.dot_dimension_numbers<[1], [0], [0], [1], [0, 0, 1, 1], [], []>} : vector<2x32xf32>, vector<32x16xf32>, vector<2x16xf32> -> vector<2x16xf32>
    %181 = arith.addf %178, %180 : vector<2x16xf32>
    %c0_73 = arith.constant 0 : index
    %c0_74 = arith.constant 0 : index
    %182 = vector.load %arg14[%c0_73, %c0_74] : memref<1x16xf32, #tpu.memory_space<vmem>>, vector<1x16xf32>
    %183 = vector.broadcast %182 : vector<1x16xf32> to vector<2x16xf32>
    %184 = arith.addf %181, %183 : vector<2x16xf32>
    %cst_75 = arith.constant 0.000000e+00 : f32
    %185 = vector.broadcast %cst_75 : f32 to vector<2x16xf32>
    %186 = arith.cmpf oge, %184, %185 : vector<2x16xf32>
    %cst_76 = arith.constant 2.000000e-01 : f32
    %187 = vector.broadcast %cst_76 : f32 to vector<2x16xf32>
    %188 = arith.mulf %187, %184 : vector<2x16xf32>
    %189 = arith.select %186, %184, %188 : vector<2x16xi1>, vector<2x16xf32>
    %190 = vector.extract_strided_slice %189 {offsets = [0, 0], sizes = [1, 16], strides = [1, 1]} : vector<2x16xf32> to vector<1x16xf32>
    %191 = vector.shape_cast %190 : vector<1x16xf32> to vector<1x16xf32>
    %192 = vector.broadcast %191 : vector<1x16xf32> to vector<16x16xf32>
    %193 = vector.extract_strided_slice %189 {offsets = [1, 0], sizes = [1, 16], strides = [1, 1]} : vector<2x16xf32> to vector<1x16xf32>
    %194 = vector.shape_cast %193 : vector<1x16xf32> to vector<1x16xf32>
    %195 = vector.broadcast %194 : vector<1x16xf32> to vector<16x16xf32>
    %196 = tpu.concatenate %192, %195 in 0 : vector<16x16xf32>, vector<16x16xf32> -> vector<32x16xf32>
    %c0_77 = arith.constant 0 : index
    %c0_78 = arith.constant 0 : index
    %197 = vector.load %arg15[%c0_77, %c0_78] : memref<64x12xf32, #tpu.memory_space<vmem>>, vector<64x12xf32>
    %c0_79 = arith.constant 0 : index
    %c0_80 = arith.constant 0 : index
    %198 = vector.load %arg16[%c0_79, %c0_80] : memref<1x12xf32, #tpu.memory_space<vmem>>, vector<1x12xf32>
    %199 = tpu.iota {dimensions = array<i32: 0>} : vector<32x1xi32>
    %c16_i32_81 = arith.constant 16 : i32
    %c0_i32_82 = arith.constant 0 : i32
    %200 = arith.cmpi eq, %c16_i32_81, %c0_i32_82 : i32
    %c1_i32_83 = arith.constant 1 : i32
    %201 = arith.select %200, %c1_i32_83, %c16_i32_81 : i32
    %202 = vector.broadcast %201 : i32 to vector<32x1xi32>
    %203 = arith.remsi %199, %202 : vector<32x1xi32>
    %c0_i32_84 = arith.constant 0 : i32
    %204 = vector.broadcast %c0_i32_84 : i32 to vector<32x1xi32>
    %205 = arith.cmpi ne, %203, %204 : vector<32x1xi32>
    %c0_i32_85 = arith.constant 0 : i32
    %206 = vector.broadcast %c0_i32_85 : i32 to vector<32x1xi32>
    %207 = arith.cmpi slt, %203, %206 : vector<32x1xi32>
    %c0_i32_86 = arith.constant 0 : i32
    %208 = arith.cmpi slt, %201, %c0_i32_86 : i32
    %209 = vector.broadcast %208 : i1 to vector<32x1xi1>
    %210 = vector.broadcast %209 : vector<32x1xi1> to vector<32x1xi1>
    %211 = arith.xori %207, %210 : vector<32x1xi1>
    %212 = arith.andi %211, %205 : vector<32x1xi1>
    %213 = vector.broadcast %201 : i32 to vector<32x1xi32>
    %214 = arith.addi %203, %213 : vector<32x1xi32>
    %215 = arith.select %212, %214, %203 : vector<32x1xi1>, vector<32x1xi32>
    %cst_87 = arith.constant 0.000000e+00 : f32
    %216 = vector.broadcast %cst_87 : f32 to vector<3x16xf32>
    %217 = tpu.concatenate %216, %196 in 0 : vector<3x16xf32>, vector<32x16xf32> -> vector<35x16xf32>
    %218 = vector.extract_strided_slice %217 {offsets = [0, 0], sizes = [32, 16], strides = [1, 1]} : vector<35x16xf32> to vector<32x16xf32>
    %c3_i32_88 = arith.constant 3 : i32
    %219 = vector.broadcast %c3_i32_88 : i32 to vector<32x1xi32>
    %220 = arith.cmpi sge, %215, %219 : vector<32x1xi32>
    %cst_89 = arith.constant 0.000000e+00 : f32
    %221 = vector.shape_cast %220 : vector<32x1xi1> to vector<32x1xi1>
    %222 = vector.broadcast %221 : vector<32x1xi1> to vector<32x16xi1>
    %223 = vector.broadcast %cst_89 : f32 to vector<32x16xf32>
    %224 = arith.select %222, %218, %223 : vector<32x16xi1>, vector<32x16xf32>
    %225 = vector.extract_strided_slice %217 {offsets = [1, 0], sizes = [32, 16], strides = [1, 1]} : vector<35x16xf32> to vector<32x16xf32>
    %c2_i32_90 = arith.constant 2 : i32
    %226 = vector.broadcast %c2_i32_90 : i32 to vector<32x1xi32>
    %227 = arith.cmpi sge, %215, %226 : vector<32x1xi32>
    %cst_91 = arith.constant 0.000000e+00 : f32
    %228 = vector.shape_cast %227 : vector<32x1xi1> to vector<32x1xi1>
    %229 = vector.broadcast %228 : vector<32x1xi1> to vector<32x16xi1>
    %230 = vector.broadcast %cst_91 : f32 to vector<32x16xf32>
    %231 = arith.select %229, %225, %230 : vector<32x16xi1>, vector<32x16xf32>
    %232 = vector.extract_strided_slice %217 {offsets = [2, 0], sizes = [32, 16], strides = [1, 1]} : vector<35x16xf32> to vector<32x16xf32>
    %c1_i32_92 = arith.constant 1 : i32
    %233 = vector.broadcast %c1_i32_92 : i32 to vector<32x1xi32>
    %234 = arith.cmpi sge, %215, %233 : vector<32x1xi32>
    %cst_93 = arith.constant 0.000000e+00 : f32
    %235 = vector.shape_cast %234 : vector<32x1xi1> to vector<32x1xi1>
    %236 = vector.broadcast %235 : vector<32x1xi1> to vector<32x16xi1>
    %237 = vector.broadcast %cst_93 : f32 to vector<32x16xf32>
    %238 = arith.select %236, %232, %237 : vector<32x16xi1>, vector<32x16xf32>
    %239 = tpu.concatenate %224, %231, %238, %196 in 1 : vector<32x16xf32>, vector<32x16xf32>, vector<32x16xf32>, vector<32x16xf32> -> vector<32x64xf32>
    %cst_94 = arith.constant dense<0.000000e+00> : vector<32x12xf32>
    %240 = tpu.matmul %239, %197, %cst_94 {dimension_numbers = #tpu.dot_dimension_numbers<[1], [0], [0], [1], [0, 0, 1, 1], [], []>} : vector<32x64xf32>, vector<64x12xf32>, vector<32x12xf32> -> vector<32x12xf32>
    %241 = vector.broadcast %198 : vector<1x12xf32> to vector<32x12xf32>
    %242 = arith.addf %240, %241 : vector<32x12xf32>
    %cst_95 = arith.constant 0.000000e+00 : f32
    %243 = vector.broadcast %cst_95 : f32 to vector<32x12xf32>
    %244 = arith.cmpf oge, %242, %243 : vector<32x12xf32>
    %cst_96 = arith.constant 2.000000e-01 : f32
    %245 = vector.broadcast %cst_96 : f32 to vector<32x12xf32>
    %246 = arith.mulf %245, %242 : vector<32x12xf32>
    %247 = arith.select %244, %242, %246 : vector<32x12xi1>, vector<32x12xf32>
    %c0_97 = arith.constant 0 : index
    %c0_98 = arith.constant 0 : index
    %248 = vector.load %arg17[%c0_97, %c0_98] : memref<48x8xf32, #tpu.memory_space<vmem>>, vector<48x8xf32>
    %c0_99 = arith.constant 0 : index
    %c0_100 = arith.constant 0 : index
    %249 = vector.load %arg18[%c0_99, %c0_100] : memref<1x8xf32, #tpu.memory_space<vmem>>, vector<1x8xf32>
    %250 = tpu.iota {dimensions = array<i32: 0>} : vector<32x1xi32>
    %c16_i32_101 = arith.constant 16 : i32
    %c0_i32_102 = arith.constant 0 : i32
    %251 = arith.cmpi eq, %c16_i32_101, %c0_i32_102 : i32
    %c1_i32_103 = arith.constant 1 : i32
    %252 = arith.select %251, %c1_i32_103, %c16_i32_101 : i32
    %253 = vector.broadcast %252 : i32 to vector<32x1xi32>
    %254 = arith.remsi %250, %253 : vector<32x1xi32>
    %c0_i32_104 = arith.constant 0 : i32
    %255 = vector.broadcast %c0_i32_104 : i32 to vector<32x1xi32>
    %256 = arith.cmpi ne, %254, %255 : vector<32x1xi32>
    %c0_i32_105 = arith.constant 0 : i32
    %257 = vector.broadcast %c0_i32_105 : i32 to vector<32x1xi32>
    %258 = arith.cmpi slt, %254, %257 : vector<32x1xi32>
    %c0_i32_106 = arith.constant 0 : i32
    %259 = arith.cmpi slt, %252, %c0_i32_106 : i32
    %260 = vector.broadcast %259 : i1 to vector<32x1xi1>
    %261 = vector.broadcast %260 : vector<32x1xi1> to vector<32x1xi1>
    %262 = arith.xori %258, %261 : vector<32x1xi1>
    %263 = arith.andi %262, %256 : vector<32x1xi1>
    %264 = vector.broadcast %252 : i32 to vector<32x1xi32>
    %265 = arith.addi %254, %264 : vector<32x1xi32>
    %266 = arith.select %263, %265, %254 : vector<32x1xi1>, vector<32x1xi32>
    %cst_107 = arith.constant 0.000000e+00 : f32
    %267 = vector.broadcast %cst_107 : f32 to vector<6x12xf32>
    %268 = tpu.concatenate %267, %247 in 0 : vector<6x12xf32>, vector<32x12xf32> -> vector<38x12xf32>
    %269 = vector.extract_strided_slice %268 {offsets = [0, 0], sizes = [32, 12], strides = [1, 1]} : vector<38x12xf32> to vector<32x12xf32>
    %c6_i32_108 = arith.constant 6 : i32
    %270 = vector.broadcast %c6_i32_108 : i32 to vector<32x1xi32>
    %271 = arith.cmpi sge, %266, %270 : vector<32x1xi32>
    %cst_109 = arith.constant 0.000000e+00 : f32
    %272 = vector.shape_cast %271 : vector<32x1xi1> to vector<32x1xi1>
    %273 = vector.broadcast %272 : vector<32x1xi1> to vector<32x12xi1>
    %274 = vector.broadcast %cst_109 : f32 to vector<32x12xf32>
    %275 = arith.select %273, %269, %274 : vector<32x12xi1>, vector<32x12xf32>
    %276 = vector.extract_strided_slice %268 {offsets = [2, 0], sizes = [32, 12], strides = [1, 1]} : vector<38x12xf32> to vector<32x12xf32>
    %c4_i32_110 = arith.constant 4 : i32
    %277 = vector.broadcast %c4_i32_110 : i32 to vector<32x1xi32>
    %278 = arith.cmpi sge, %266, %277 : vector<32x1xi32>
    %cst_111 = arith.constant 0.000000e+00 : f32
    %279 = vector.shape_cast %278 : vector<32x1xi1> to vector<32x1xi1>
    %280 = vector.broadcast %279 : vector<32x1xi1> to vector<32x12xi1>
    %281 = vector.broadcast %cst_111 : f32 to vector<32x12xf32>
    %282 = arith.select %280, %276, %281 : vector<32x12xi1>, vector<32x12xf32>
    %283 = vector.extract_strided_slice %268 {offsets = [4, 0], sizes = [32, 12], strides = [1, 1]} : vector<38x12xf32> to vector<32x12xf32>
    %c2_i32_112 = arith.constant 2 : i32
    %284 = vector.broadcast %c2_i32_112 : i32 to vector<32x1xi32>
    %285 = arith.cmpi sge, %266, %284 : vector<32x1xi32>
    %cst_113 = arith.constant 0.000000e+00 : f32
    %286 = vector.shape_cast %285 : vector<32x1xi1> to vector<32x1xi1>
    %287 = vector.broadcast %286 : vector<32x1xi1> to vector<32x12xi1>
    %288 = vector.broadcast %cst_113 : f32 to vector<32x12xf32>
    %289 = arith.select %287, %283, %288 : vector<32x12xi1>, vector<32x12xf32>
    %290 = tpu.concatenate %275, %282, %289, %247 in 1 : vector<32x12xf32>, vector<32x12xf32>, vector<32x12xf32>, vector<32x12xf32> -> vector<32x48xf32>
    %cst_114 = arith.constant dense<0.000000e+00> : vector<32x8xf32>
    %291 = tpu.matmul %290, %248, %cst_114 {dimension_numbers = #tpu.dot_dimension_numbers<[1], [0], [0], [1], [0, 0, 1, 1], [], []>} : vector<32x48xf32>, vector<48x8xf32>, vector<32x8xf32> -> vector<32x8xf32>
    %292 = vector.broadcast %249 : vector<1x8xf32> to vector<32x8xf32>
    %293 = arith.addf %291, %292 : vector<32x8xf32>
    %cst_115 = arith.constant 0.000000e+00 : f32
    %294 = vector.broadcast %cst_115 : f32 to vector<32x8xf32>
    %295 = arith.cmpf oge, %293, %294 : vector<32x8xf32>
    %cst_116 = arith.constant 2.000000e-01 : f32
    %296 = vector.broadcast %cst_116 : f32 to vector<32x8xf32>
    %297 = arith.mulf %296, %293 : vector<32x8xf32>
    %298 = arith.select %295, %293, %297 : vector<32x8xi1>, vector<32x8xf32>
    %c0_117 = arith.constant 0 : index
    %c0_118 = arith.constant 0 : index
    %299 = vector.load %arg19[%c0_117, %c0_118] : memref<32x8xf32, #tpu.memory_space<vmem>>, vector<32x8xf32>
    %c0_119 = arith.constant 0 : index
    %c0_120 = arith.constant 0 : index
    %300 = vector.load %arg20[%c0_119, %c0_120] : memref<1x8xf32, #tpu.memory_space<vmem>>, vector<1x8xf32>
    %301 = tpu.iota {dimensions = array<i32: 0>} : vector<32x1xi32>
    %c16_i32_121 = arith.constant 16 : i32
    %c0_i32_122 = arith.constant 0 : i32
    %302 = arith.cmpi eq, %c16_i32_121, %c0_i32_122 : i32
    %c1_i32_123 = arith.constant 1 : i32
    %303 = arith.select %302, %c1_i32_123, %c16_i32_121 : i32
    %304 = vector.broadcast %303 : i32 to vector<32x1xi32>
    %305 = arith.remsi %301, %304 : vector<32x1xi32>
    %c0_i32_124 = arith.constant 0 : i32
    %306 = vector.broadcast %c0_i32_124 : i32 to vector<32x1xi32>
    %307 = arith.cmpi ne, %305, %306 : vector<32x1xi32>
    %c0_i32_125 = arith.constant 0 : i32
    %308 = vector.broadcast %c0_i32_125 : i32 to vector<32x1xi32>
    %309 = arith.cmpi slt, %305, %308 : vector<32x1xi32>
    %c0_i32_126 = arith.constant 0 : i32
    %310 = arith.cmpi slt, %303, %c0_i32_126 : i32
    %311 = vector.broadcast %310 : i1 to vector<32x1xi1>
    %312 = vector.broadcast %311 : vector<32x1xi1> to vector<32x1xi1>
    %313 = arith.xori %309, %312 : vector<32x1xi1>
    %314 = arith.andi %313, %307 : vector<32x1xi1>
    %315 = vector.broadcast %303 : i32 to vector<32x1xi32>
    %316 = arith.addi %305, %315 : vector<32x1xi32>
    %317 = arith.select %314, %316, %305 : vector<32x1xi1>, vector<32x1xi32>
    %cst_127 = arith.constant 0.000000e+00 : f32
    %318 = vector.broadcast %cst_127 : f32 to vector<12x8xf32>
    %319 = tpu.concatenate %318, %298 in 0 : vector<12x8xf32>, vector<32x8xf32> -> vector<44x8xf32>
    %320 = vector.extract_strided_slice %319 {offsets = [0, 0], sizes = [32, 8], strides = [1, 1]} : vector<44x8xf32> to vector<32x8xf32>
    %c12_i32_128 = arith.constant 12 : i32
    %321 = vector.broadcast %c12_i32_128 : i32 to vector<32x1xi32>
    %322 = arith.cmpi sge, %317, %321 : vector<32x1xi32>
    %cst_129 = arith.constant 0.000000e+00 : f32
    %323 = vector.shape_cast %322 : vector<32x1xi1> to vector<32x1xi1>
    %324 = vector.broadcast %323 : vector<32x1xi1> to vector<32x8xi1>
    %325 = vector.broadcast %cst_129 : f32 to vector<32x8xf32>
    %326 = arith.select %324, %320, %325 : vector<32x8xi1>, vector<32x8xf32>
    %327 = vector.extract_strided_slice %319 {offsets = [4, 0], sizes = [32, 8], strides = [1, 1]} : vector<44x8xf32> to vector<32x8xf32>
    %c8_i32_130 = arith.constant 8 : i32
    %328 = vector.broadcast %c8_i32_130 : i32 to vector<32x1xi32>
    %329 = arith.cmpi sge, %317, %328 : vector<32x1xi32>
    %cst_131 = arith.constant 0.000000e+00 : f32
    %330 = vector.shape_cast %329 : vector<32x1xi1> to vector<32x1xi1>
    %331 = vector.broadcast %330 : vector<32x1xi1> to vector<32x8xi1>
    %332 = vector.broadcast %cst_131 : f32 to vector<32x8xf32>
    %333 = arith.select %331, %327, %332 : vector<32x8xi1>, vector<32x8xf32>
    %334 = vector.extract_strided_slice %319 {offsets = [8, 0], sizes = [32, 8], strides = [1, 1]} : vector<44x8xf32> to vector<32x8xf32>
    %c4_i32_132 = arith.constant 4 : i32
    %335 = vector.broadcast %c4_i32_132 : i32 to vector<32x1xi32>
    %336 = arith.cmpi sge, %317, %335 : vector<32x1xi32>
    %cst_133 = arith.constant 0.000000e+00 : f32
    %337 = vector.shape_cast %336 : vector<32x1xi1> to vector<32x1xi1>
    %338 = vector.broadcast %337 : vector<32x1xi1> to vector<32x8xi1>
    %339 = vector.broadcast %cst_133 : f32 to vector<32x8xf32>
    %340 = arith.select %338, %334, %339 : vector<32x8xi1>, vector<32x8xf32>
    %341 = tpu.concatenate %326, %333, %340, %298 in 1 : vector<32x8xf32>, vector<32x8xf32>, vector<32x8xf32>, vector<32x8xf32> -> vector<32x32xf32>
    %cst_134 = arith.constant dense<0.000000e+00> : vector<32x8xf32>
    %342 = tpu.matmul %341, %299, %cst_134 {dimension_numbers = #tpu.dot_dimension_numbers<[1], [0], [0], [1], [0, 0, 1, 1], [], []>} : vector<32x32xf32>, vector<32x8xf32>, vector<32x8xf32> -> vector<32x8xf32>
    %343 = vector.broadcast %300 : vector<1x8xf32> to vector<32x8xf32>
    %344 = arith.addf %342, %343 : vector<32x8xf32>
    %cst_135 = arith.constant 0.000000e+00 : f32
    %345 = vector.broadcast %cst_135 : f32 to vector<32x8xf32>
    %346 = arith.cmpf oge, %344, %345 : vector<32x8xf32>
    %cst_136 = arith.constant 2.000000e-01 : f32
    %347 = vector.broadcast %cst_136 : f32 to vector<32x8xf32>
    %348 = arith.mulf %347, %344 : vector<32x8xf32>
    %349 = arith.select %346, %344, %348 : vector<32x8xi1>, vector<32x8xf32>
    %c0_137 = arith.constant 0 : index
    %c0_138 = arith.constant 0 : index
    %350 = vector.load %arg21[%c0_137, %c0_138] : memref<32x8xf32, #tpu.memory_space<vmem>>, vector<32x8xf32>
    tpu.vector_store %arg21[%c0_137, %c0_138], %349 {strides = array<i32>} : memref<32x8xf32, #tpu.memory_space<vmem>>, vector<32x8xf32>,
    return
  }
}

</mosaic_0001>

<bundles_post_ra>
// kernel: tpu_custom_call.1
= control target key start
LH: loop header
LB: loop body
LE: loop exit
PB: predicated region body
PF: predicated region fallthrough
CT: control target
= control target key end

     0   :  { %v77_v0 = vlaneseq  ;;  %vm134_vm0 = vcmask 1042432   ;;  %s1450_s30 = smov 24   ;;  %vm176_vm1 = vcmask 1046528   ;;  %vm206_vm3 = vcmask 1045504   ;;  %s1452_s22 = smov 16   ;;  %s2156_s0 = inlined_call_operand.vmem [shape: f32[32,8], index: 0, kind: input, shape index: {}]   ;;  %s2157_s3 = inlined_call_operand.vmem [shape: f32[1,8], index: 3, kind: input, shape index: {}]   ;;  %s2158_s2 = inlined_call_operand.vmem [shape: f32[32,8], index: 2, kind: input, shape index: {}]   ;;  %s2159_s5 = inlined_call_operand.vmem [shape: f32[1,12], index: 5, kind: input, shape index: {}]   ;;  %s2160_s4 = inlined_call_operand.vmem [shape: f32[32,12], index: 4, kind: input, shape index: {}]   ;;  %s2161_s7 = inlined_call_operand.vmem [shape: f32[1,16], index: 7, kind: input, shape index: {}]   ;;  %s2162_s6 = inlined_call_operand.vmem [shape: f32[48,16], index: 6, kind: input, shape index: {}]   ;;  %s2163_s9 = inlined_call_operand.vmem [shape: f32[1,32], index: 9, kind: input, shape index: {}]   ;;  %s2164_s8 = inlined_call_operand.vmem [shape: f32[16,32], index: 8, kind: input, shape index: {}]   ;;  %s2165_s10 = inlined_call_operand.vmem [shape: f32[96,32], index: 10, kind: input, shape index: {}]   ;;  %s2166_s12 = inlined_call_operand.vmem [shape: f32[32,16], index: 12, kind: input, shape index: {}]   ;;  %s2167_s1 = inlined_call_operand.vmem [shape: f32[2,96], index: 1, kind: input, shape index: {}]   ;;  %s2168_s11 = inlined_call_operand.vmem [shape: f32[1,32], index: 11, kind: input, shape index: {}]   ;;  %s2169_s13 = inlined_call_operand.vmem [shape: f32[32,16], index: 13, kind: input, shape index: {}]   ;;  %s2170_s14 = inlined_call_operand.vmem [shape: f32[1,16], index: 14, kind: input, shape index: {}]   ;;  %s2171_s15 = inlined_call_operand.vmem [shape: f32[64,12], index: 15, kind: input, shape index: {}]   ;;  %s2172_s16 = inlined_call_operand.vmem [shape: f32[1,12], index: 16, kind: input, shape index: {}]   ;;  %s2173_s18 = inlined_call_operand.vmem [shape: f32[1,8], index: 18, kind: input, shape index: {}]   ;;  %s2174_s17 = inlined_call_operand.vmem [shape: f32[48,8], index: 17, kind: input, shape index: {}]   ;;  %s2175_s20 = inlined_call_operand.vmem [shape: f32[1,8], index: 20, kind: input, shape index: {}]   ;;  %s2176_s19 = inlined_call_operand.vmem [shape: f32[32,8], index: 19, kind: input, shape index: {}]   ;;  %s2177_s21 = inlined_call_operand.vmem [shape: f32[32,8], index: 21, kind: output, shape index: {}]  }
   0x1   :  { %2192 = sst [smem:[#allocation2_spill]] %s2156_s0  ;;  %vm2184_vm8 = vcmask 64512   ;;  %vm273_vm9 = vcmask 130048   ;;  %vm2189_vm10 = vcmask 195584   ;;  %vm286_vm11 = vcmask 261120   ;;  %s1454_s29 = smov 12  }
   0x2   :  { %2193 = sst [smem:[#allocation3_spill]] %s2157_s3  ;;  %v1581_v8 = vshrl.u32 %v77_v0, 7  ;;  %vm2191_vm15 = vcmask 1043456   ;;  %s1455_s3 = smov 36  }
   0x3   :  { %2194 = sst [smem:[#allocation4_spill]] %s2158_s2 }
   0x4   :  { %2195 = sst [smem:[#allocation5_spill]] %s2159_s5  ;;  %v1588_v12 = vand.u32 15, %v1581_v8  ;;  %v80_v19 = vadd.s32 16, %v1581_v8  ;;  %s1457_s5 = smov 32  }
   0x5   :  { %2196 = sst [smem:[#allocation6_spill]] %s2160_s4 }
   0x6   :  { %2197 = sst [smem:[#allocation7_spill]] %s2161_s7  ;;  %vm163_vm2 = vcmp.ge.s32.totalorder %v1588_v12, 2  ;;  %v1606_v25 = vand.u32 15, %v80_v19  ;;  %s1451_s7 = smov 8   ;;  %vm194_vm4 = vcmp.ge.s32.totalorder %v1588_v12, 1  ;;  %vm2185_vm7 = vcmp.ge.s32.totalorder %v1588_v12, 3 }
   0x7   :  { %s2198_s26 = sld [smem:[#allocation2_spill]] }
   0x8   :  { %vm196_vm5 = vcmp.ge.s32.totalorder %v1606_v25, 1  ;;  %vm165_vm6 = vcmp.ge.s32.totalorder %v1606_v25, 2  ;;  %s2199_s24 = sld [smem:[#allocation4_spill]]  ;;  %vm2181_vm12 = vcmp.ge.s32.totalorder %v1606_v25, 3 }
   0x9   :  { %s2200_s4 = sld [smem:[#allocation3_spill]] }
   0xa   :  { %s2202_s23 = sld [smem:[#allocation5_spill]] }
   0xb   :  { %s2207_s2 = sld [smem:[#allocation7_spill]] }
   0xd   :  { %v68_v1 = vld [vmem:[%s2198_s26] sm:$0xff]  ;;  %v69_v2 = vld [vmem:[%s2198_s26 + $0x8] sm:$0xff]  ;;  %v70_v3 = vld [vmem:[%s2198_s26 + $0x10] sm:$0xff] }
   0xe   :  { %v71_v4 = vld [vmem:[%s2198_s26 + $0x18] sm:$0xff]  ;;  %v136_v5 = vrot.slane %v69_v2, 5  ;;  %v138_v6 = vrot.slane %v70_v3, 5  ;;  %256 = vrot.lane.b32.xlu1 %v68_v1, %s1450_s30  ;;  %v135_v7 = vrot.slane %v68_v1, 5  ;;  %v74_v40 = vld [vmem:[%s2199_s24 + $0x10] sm:$0xff]  ;;  %v73_v41 = vld [vmem:[%s2199_s24 + $0x8] sm:$0xff] }
   0xf   :  { %v140_v9 = vrot.slane %v71_v4, 5  ;;  %v75_v39 = vld [vmem:[%s2199_s24 + $0x18] sm:$0xff]  ;;  %v72_v42 = vld [vmem:[%s2199_s24] sm:$0xff]  ;;  %s2201_s24 = sld [smem:[#allocation6_spill]] }
  0x10   :  { %v1584_v10 = vsel %vm134_vm0, %v135_v7, %v136_v5  ;;  %v146_v11 = vsel %vm134_vm0, 0.0, %v135_v7  ;;  %v1591_v13 = vsel %vm134_vm0, %v136_v5, %v138_v6  ;;  %311 = vmatpush.msra.mxu0 %v75_v39  ;;  %v1441_v5 = vld [vmem:[%s2200_s4] ss:$0 sm:$0xff] }
  0x11   :  { %v177_v14 = vrot.slane %v146_v11, 1  ;;  %v178_v15 = vrot.slane %v1584_v10, 1  ;;  %v180_v16 = vrot.slane %v1591_v13, 1  ;;  %v207_v17 = vrot.slane %v146_v11, 2 }
  0x12   :  { %v208_v18 = vrot.slane %v1584_v10, 2  ;;  %v1601_v22 = vsel %vm134_vm0, %v138_v6, %v140_v9  ;;  %v210_v23 = vrot.slane %v1591_v13, 2  ;;  %v214_v34 = vrot.slane %v140_v9, 2  ;;  %312 = vmatpush.msra.mxu0 %v74_v40 }
  0x13   :  { %v179_v20 = vsel %vm176_vm1, %v177_v14, %v178_v15  ;;  %v181_v21 = vsel %vm176_vm1, %v178_v15, %v180_v16  ;;  %v212_v26 = vrot.slane %v1601_v22, 2  ;;  %v182_v31 = vrot.slane %v1601_v22, 1 }
  0x14   :  { %v190_v24 = vsel %vm163_vm2, %v179_v20, 0.0  ;;  %v211_v27 = vsel %vm206_vm3, %v208_v18, %v210_v23  ;;  %v209_v28 = vsel %vm206_vm3, %v207_v17, %v208_v18  ;;  %v184_v37 = vrot.slane %v140_v9, 1  ;;  %313 = vmatpush.msra.mxu0 %v73_v41 }
  0x15   :  { %228 = vrot.lane.b32.xlu0 %v190_v24, %s1451_s7  ;;  %246 = vrot.lane.b32.xlu2 %v211_v27, %s1452_s22  ;;  %v213_v29 = vsel %vm206_vm3, %v210_v23, %v212_v26  ;;  %v220_v30 = vsel %vm194_vm4, %v209_v28, 0.0  ;;  %v183_v33 = vsel %vm176_vm1, %v180_v16, %v182_v31  ;;  %v215_v36 = vsel %vm206_vm3, %v212_v26, %v214_v34 }
  0x16   :  { %230 = vrot.lane.b32.xlu1 %v181_v21, %s1451_s7  ;;  %v222_v32 = vsel %vm196_vm5, %v213_v29, 0.0  ;;  %v192_v35 = vsel %vm165_vm6, %v183_v33, 0.0  ;;  %v185_v38 = vsel %vm176_vm1, %v182_v31, %v184_v37  ;;  %314 = vmatpush.msra.mxu0 %v72_v42  ;;  %v159_v46 = vsel %vm2185_vm7, %v146_v11, 0.0 }
  0x17   :  { %v161_v55 = vsel %vm2181_vm12, %v1591_v13, 0.0 }
  0x1d   :  { %244 = vrot.lane.b32.xlu0 %v220_v30, %s1452_s22  ;;  %258 = vrot.lane.b32.xlu2 %v69_v2, %s1450_s30 }
  0x1e   :  { %248 = vrot.lane.b32.xlu1 %v222_v32, %s1452_s22 }
  0x25   :  { %232 = vrot.lane.b32.xlu0 %v192_v35, %s1451_s7  ;;  %260 = vrot.lane.b32.xlu2 %v70_v3, %s1450_s30 }
  0x26   :  { %250 = vrot.lane.b32.xlu1 %v215_v36, %s1452_s22 }
  0x2d   :  { %234 = vrot.lane.b32.xlu0 %v185_v38, %s1451_s7  ;;  %262 = vrot.lane.b32.xlu2 %v71_v4, %s1450_s30 }
  0x6f   :  { %v247_v45 = vpop.permute.xlu2 %246 }
  0x77   :  { %v259_v52 = vpop.permute.xlu2 %258 }
  0x7f   :  { %v261_v60 = vpop.permute.xlu2 %260 }
  0x80   :  { %v257_v43 = vpop.permute.xlu1 %256 }
  0x87   :  { %v229_v44 = vpop.permute.xlu0 %228  ;;  %v263_v3 = vpop.permute.xlu2 %262 }
  0x88   :  { %v269_v47 = vsel %vm2184_vm8, %v159_v46, %v229_v44  ;;  %v231_v48 = vpop.permute.xlu1 %230 }
  0x89   :  { %v270_v53 = vsel %vm2184_vm8, %v1584_v10, %v231_v48 }
  0x8a   :  { %v275_v54 = vsel %vm273_vm9, %v270_v53, %v247_v45 }
  0x8b   :  { %v280_v58 = vsel %vm2189_vm10, %v275_v54, %v259_v52 }
  0x8f   :  { %v245_v49 = vpop.permute.xlu0 %244 }
  0x90   :  { %v274_v50 = vsel %vm273_vm9, %v269_v47, %v245_v49  ;;  %v249_v57 = vpop.permute.xlu1 %248 }
  0x91   :  { %v279_v51 = vsel %vm2189_vm10, %v274_v50, %v257_v43 }
  0x92   :  { %1385 = vmatmul.msk.f32.vlgmr.msra.gmra.mxu0 %vm286_vm11, %v279_v51 }
  0x97   :  { %v233_v56 = vpop.permute.xlu0 %232 }
  0x98   :  { %v271_v59 = vsel %vm2184_vm8, %v161_v55, %v233_v56  ;;  %v251_v1 = vpop.permute.xlu1 %250  ;;  %v343_v55 = vld [vmem:[%s2201_s24 + $0x18] sm:$0xff]  ;;  %v342_v56 = vld [vmem:[%s2201_s24 + $0x10] sm:$0xff] }
  0x99   :  { %v276_v61 = vsel %vm273_vm9, %v271_v59, %v249_v57  ;;  %508 = vmatpush.msra.mxu1 %v343_v55  ;;  %v341_v57 = vld [vmem:[%s2201_s24 + $0x8] sm:$0xff] }
  0x9a   :  { %1386 = vmatmul.msk.f32.gmra.mxu0 %vm286_vm11, %v280_v58  ;;  %v281_v62 = vsel %vm2189_vm10, %v276_v61, %v261_v60  ;;  %v340_v58 = vld [vmem:[%s2201_s24] sm:$0xff] }
  0x9b   :  { %509 = vmatpush.msra.mxu1 %v342_v56 }
  0x9d   :  { %510 = vmatpush.msra.mxu1 %v341_v57 }
  0x9f   :  { %v235_v63 = vpop.permute.xlu0 %234  ;;  %511 = vmatpush.msra.mxu1 %v340_v58  ;;  %v542_v58 = vld [vmem:[%s2162_s6 + $0x28] sm:$0xff] }
  0xa0   :  { %v272_v0 = vsel %vm2184_vm8, %v1601_v22, %v235_v63  ;;  %691 = vmatpush.msrb.mxu0 %v542_v58  ;;  %1413 = vmatpush.msra.mxu2 %v542_v58  ;;  %v817_v58 = vld [vmem:[%s2166_s12 + $0x10] sm:$0xff] }
  0xa1   :  { %v277_v2 = vsel %vm273_vm9, %v272_v0, %v251_v1 }
  0xa2   :  { %1387 = vmatmul.msk.f32.gmra.mxu0 %vm286_vm11, %v281_v62  ;;  %v282_v4 = vsel %vm2189_vm10, %v277_v2, %v263_v3 }
  0xaa   :  { %1388 = vmatmul.msk.f32.gmra.mxu0 %vm286_vm11, %v282_v4 }
 0x10f   :  { %v316_v6 = vpop.f32.mrf.mxu0 }
 0x110   :  { %v317_v7 = vadd.f32 %v1441_v5, %v316_v6 }
 0x112   :  { %v332_v9 = vmul.f32 0.2, %v317_v7  ;;  %vm328_vm13 = vcmp.ge.f32.partialorder %v317_v7, 0.0 }
 0x114   :  { %v336_v10 = vsel %vm328_vm13, %v317_v7, %v332_v9  ;;  %vm2187_vm13 = vcmp.ge.s32.totalorder %v1588_v12, 4 }
 0x115   :  { %457 = vrot.lane.b32.xlu2 %v336_v10, %s1450_s30  ;;  %v349_v13 = vrot.slane %v336_v10, 2 }
 0x117   :  { %v319_v11 = vpop.f32.mrf.mxu0  ;;  %v1678_v16 = vsel %vm206_vm3, 0.0, %v349_v13 }
 0x118   :  { %v320_v14 = vadd.f32 %v1441_v5, %v319_v11  ;;  %v390_v19 = vrot.slane %v1678_v16, 2  ;;  %v408_v22 = vrot.slane %v1678_v16, 4 }
 0x11a   :  { %v333_v15 = vmul.f32 0.2, %v320_v14  ;;  %vm329_vm14 = vcmp.ge.f32.partialorder %v320_v14, 0.0 }
 0x11c   :  { %v337_v17 = vsel %vm329_vm14, %v320_v14, %v333_v15 }
 0x11d   :  { %v350_v18 = vrot.slane %v337_v17, 2  ;;  %459 = vrot.lane.b32.xlu2 %v337_v17, %s1450_s30 }
 0x11f   :  { %v1683_v20 = vsel %vm206_vm3, %v349_v13, %v350_v18  ;;  %v322_v21 = vpop.f32.mrf.mxu0 }
 0x120   :  { %v323_v23 = vadd.f32 %v1441_v5, %v322_v21  ;;  %v409_v24 = vrot.slane %v1683_v20, 4  ;;  %v391_v26 = vrot.slane %v1683_v20, 2 }
 0x122   :  { %v334_v27 = vmul.f32 0.2, %v323_v23  ;;  %v410_v28 = vsel %vm2191_vm15, %v408_v22, %v409_v24  ;;  %v392_v29 = vsel %vm206_vm3, %v390_v19, %v391_v26  ;;  %vm330_vm14 = vcmp.ge.f32.partialorder %v323_v23, 0.0 }
 0x123   :  { %v421_v30 = vsel %vm163_vm2, %v410_v28, 0.0  ;;  %v403_v31 = vsel %vm2187_vm13, %v392_v29, 0.0 }
 0x124   :  { %445 = vrot.lane.b32.xlu1 %v421_v30, %s1452_s22  ;;  %429 = vrot.lane.b32.xlu0 %v403_v31, %s1451_s7  ;;  %v338_v32 = vsel %vm330_vm14, %v323_v23, %v334_v27  ;;  %vm2186_vm14 = vcmp.ge.s32.totalorder %v1606_v25, 4  ;;  %v1453_v23 = vmov 0.0  }
 0x125   :  { %461 = vrot.lane.b32.xlu2 %v338_v32, %s1450_s30  ;;  %v352_v33 = vrot.slane %v338_v32, 2 }
 0x127   :  { %v353_v34 = vsel %vm206_vm3, %v350_v18, %v352_v33  ;;  %v325_v35 = vpop.f32.mrf.mxu0 }
 0x128   :  { %v326_v36 = vadd.f32 %v1441_v5, %v325_v35  ;;  %v411_v37 = vrot.slane %v353_v34, 4  ;;  %v393_v38 = vrot.slane %v353_v34, 2 }
 0x12a   :  { %v335_v39 = vmul.f32 0.2, %v326_v36  ;;  %v412_v40 = vsel %vm2191_vm15, %v409_v24, %v411_v37  ;;  %v394_v41 = vsel %vm206_vm3, %v391_v26, %v393_v38  ;;  %vm331_vm12 = vcmp.ge.f32.partialorder %v326_v36, 0.0  ;;  %v1442_v24 = vld [vmem:[%s2202_s23] ss:$0 sm:$0xff] }
 0x12c   :  { %447 = vrot.lane.b32.xlu1 %v412_v40, %s1452_s22  ;;  %431 = vrot.lane.b32.xlu0 %v394_v41, %s1451_s7  ;;  %v339_v42 = vsel %vm331_vm12, %v326_v36, %v335_v39  ;;  %vm2182_vm12 = vcmp.ge.s32.totalorder %v1588_v12, 6 }
 0x12d   :  { %463 = vrot.lane.b32.xlu2 %v339_v42, %s1450_s30  ;;  %v354_v43 = vrot.slane %v339_v42, 2  ;;  %v373_v61 = vsel %vm2182_vm12, %v1678_v16, 0.0  ;;  %vm2183_vm12 = vcmp.ge.s32.totalorder %v1606_v25, 6 }
 0x12e   :  { %v375_v11 = vsel %vm2183_vm12, %v353_v34, 0.0 }
 0x12f   :  { %v355_v44 = vsel %vm206_vm3, %v352_v33, %v354_v43  ;;  %v415_v51 = vrot.slane %v354_v43, 4  ;;  %v397_v52 = vrot.slane %v354_v43, 2 }
 0x130   :  { %v413_v45 = vrot.slane %v355_v44, 4  ;;  %v395_v46 = vrot.slane %v355_v44, 2 }
 0x132   :  { %v414_v47 = vsel %vm2191_vm15, %v411_v37, %v413_v45  ;;  %v396_v48 = vsel %vm206_vm3, %v393_v38, %v395_v46  ;;  %v416_v53 = vsel %vm2191_vm15, %v413_v45, %v415_v51  ;;  %v398_v54 = vsel %vm206_vm3, %v395_v46, %v397_v52 }
 0x133   :  { %v423_v49 = vsel %vm165_vm6, %v414_v47, 0.0  ;;  %v405_v50 = vsel %vm2186_vm14, %v396_v48, 0.0 }
 0x134   :  { %449 = vrot.lane.b32.xlu1 %v423_v49, %s1452_s22  ;;  %433 = vrot.lane.b32.xlu0 %v405_v50, %s1451_s7 }
 0x13c   :  { %451 = vrot.lane.b32.xlu1 %v416_v53, %s1452_s22  ;;  %435 = vrot.lane.b32.xlu0 %v398_v54, %s1451_s7 }
 0x144   :  { %1432 = vrot.lane.b32.xlu0 %v1453_v23, %s1454_s29 }
 0x16f   :  { %v458_v59 = vpop.permute.xlu2 %457 }
 0x177   :  { %v460_v2 = vpop.permute.xlu2 %459 }
 0x17f   :  { %v462_v9 = vpop.permute.xlu2 %461 }
 0x196   :  { %v446_v60 = vpop.permute.xlu1 %445  ;;  %v430_v62 = vpop.permute.xlu0 %429 }
 0x197   :  { %v469_v63 = vsel %vm2184_vm8, %v373_v61, %v430_v62  ;;  %v539_v61 = vld [vmem:[%s2162_s6 + $0x10] sm:$0xff]  ;;  %v538_v62 = vld [vmem:[%s2162_s6 + $0x8] sm:$0xff] }
 0x198   :  { %v473_v0 = vsel %vm273_vm9, %v469_v63, %v446_v60  ;;  %v540_v60 = vld [vmem:[%s2162_s6 + $0x18] sm:$0xff]  ;;  %v537_v63 = vld [vmem:[%s2162_s6] sm:$0xff] }
 0x199   :  { %v477_v1 = vsel %vm2189_vm10, %v473_v0, %v458_v59  ;;  %v541_v59 = vld [vmem:[%s2162_s6 + $0x20] sm:$0xff] }
 0x19a   :  { %1389 = vmatmul.msk.f32.vlgmr.msra.gmra.mxu1 %vm286_vm11, %v477_v1  ;;  %692 = vmatpush.msrb.mxu0 %v541_v59 }
 0x19b   :  { %1414 = vmatpush.msra.mxu2 %v541_v59 }
 0x19c   :  { %693 = vmatpush.msrb.mxu0 %v540_v60 }
 0x19d   :  { %1415 = vmatpush.msra.mxu2 %v540_v60 }
 0x19e   :  { %v448_v3 = vpop.permute.xlu1 %447  ;;  %v432_v4 = vpop.permute.xlu0 %431  ;;  %694 = vmatpush.msrb.mxu0 %v539_v61 }
 0x19f   :  { %v470_v5 = vsel %vm2184_vm8, %v1683_v20, %v432_v4  ;;  %v464_v20 = vpop.permute.xlu2 %463  ;;  %1416 = vmatpush.msra.mxu2 %v539_v61 }
 0x1a0   :  { %v474_v6 = vsel %vm273_vm9, %v470_v5, %v448_v3  ;;  %695 = vmatpush.msrb.mxu0 %v538_v62 }
 0x1a1   :  { %v478_v7 = vsel %vm2189_vm10, %v474_v6, %v460_v2  ;;  %1417 = vmatpush.msra.mxu2 %v538_v62 }
 0x1a2   :  { %1390 = vmatmul.msk.f32.gmra.mxu1 %vm286_vm11, %v478_v7  ;;  %696 = vmatpush.msrb.mxu0 %v537_v63 }
 0x1a3   :  { %1418 = vmatpush.msra.mxu2 %v537_v63 }
 0x1a6   :  { %v450_v10 = vpop.permute.xlu1 %449  ;;  %v434_v13 = vpop.permute.xlu0 %433 }
 0x1a7   :  { %v471_v14 = vsel %vm2184_vm8, %v375_v11, %v434_v13 }
 0x1a8   :  { %v475_v15 = vsel %vm273_vm9, %v471_v14, %v450_v10 }
 0x1a9   :  { %v479_v16 = vsel %vm2189_vm10, %v475_v15, %v462_v9  ;;  %v81_v15 = vadd.s32 24, %v1581_v8 }
 0x1aa   :  { %1391 = vmatmul.msk.f32.gmra.mxu1 %vm286_vm11, %v479_v16 }
 0x1ae   :  { %v452_v17 = vpop.permute.xlu1 %451  ;;  %v436_v18 = vpop.permute.xlu0 %435 }
 0x1af   :  { %v472_v19 = vsel %vm2184_vm8, %v355_v44, %v436_v18  ;;  %v79_v18 = vadd.s32 8, %v1581_v8 }
 0x1b0   :  { %v476_v21 = vsel %vm273_vm9, %v472_v19, %v452_v17  ;;  %v107_v17 = vand.u32 15, %v81_v15 }
 0x1b1   :  { %v480_v22 = vsel %vm2189_vm10, %v476_v21, %v464_v20  ;;  %v93_v21 = vand.u32 15, %v79_v18  ;;  %v1449_v20 = vld [vmem:[%s2175_s20] ss:$0 sm:$0xff] }
 0x1b2   :  { %1392 = vmatmul.msk.f32.gmra.mxu1 %vm286_vm11, %v480_v22 }
 0x1b6   :  { %v1433_v0 = vpop.permute.xlu0 %1432 }
 0x1b7   :  { %v1435_v2 = vunpack.i.h.bf16 %v1433_v0  ;;  %v1434_v9 = vunpack.i.l.bf16 %v1433_v0 }
 0x217   :  { %v513_v26 = vpop.f32.mrf.mxu1 }
 0x218   :  { %v514_v27 = vadd.f32 %v1442_v24, %v513_v26 }
 0x21a   :  { %vm525_vm12 = vcmp.ge.f32.partialorder %v514_v27, 0.0  ;;  %v529_v28 = vmul.f32 0.2, %v514_v27 }
 0x21c   :  { %v533_v29 = vsel %vm525_vm12, %v514_v27, %v529_v28  ;;  %vm2188_vm12 = vcmask 293888  }
 0x21d   :  { %v548_v30 = vrot.slane %v533_v29, 4 }
 0x21f   :  { %v516_v31 = vpop.f32.mrf.mxu1  ;;  %v1760_v32 = vsel %vm2191_vm15, 0.0, %v548_v30 }
 0x220   :  { %v603_v33 = vsel %vm2187_vm13, %v1760_v32, 0.0  ;;  %v517_v34 = vadd.f32 %v1442_v24, %v516_v31  ;;  %v587_v53 = vrot.slane %v1760_v32, 4  ;;  %vm1824_vm13 = vcmp.ge.s32.totalorder %v93_v21, 12 }
 0x221   :  { %627 = vrot.lane.b32.xlu0 %v603_v33, %s1450_s30  ;;  %v569_v31 = vsel %vm1824_vm13, %v1760_v32, 0.0  ;;  %v783_v32 = vld [vmem:[%s2165_s10 + $0x58] sm:$0xff] }
 0x222   :  { %v530_v35 = vmul.f32 0.2, %v517_v34  ;;  %vm526_vm8 = vcmp.ge.f32.partialorder %v517_v34, 0.0 }
 0x224   :  { %v534_v38 = vsel %vm526_vm8, %v517_v34, %v530_v35 }
 0x225   :  { %v549_v41 = vrot.slane %v534_v38, 4 }
 0x227   :  { %v519_v36 = vpop.f32.mrf.mxu1  ;;  %v550_v50 = vsel %vm2191_vm15, %v548_v30, %v549_v41 }
 0x228   :  { %v520_v37 = vadd.f32 %v1442_v24, %v519_v36  ;;  %v589_v52 = vrot.slane %v550_v50, 4 }
 0x22a   :  { %v531_v39 = vmul.f32 0.2, %v520_v37  ;;  %vm527_vm7 = vcmp.ge.f32.partialorder %v520_v37, 0.0  ;;  %v590_v55 = vsel %vm2191_vm15, %v587_v53, %v589_v52 }
 0x22c   :  { %v535_v40 = vsel %vm527_vm7, %v520_v37, %v531_v39  ;;  %vm2190_vm7 = vcmask 97280   ;;  %v743_v37 = vld [vmem:[%s2164_s8 + $0x8] sm:$0xff]  ;;  %v782_v39 = vld [vmem:[%s2165_s10 + $0x50] sm:$0xff] }
 0x22d   :  { %643 = vrot.lane.b32.xlu2 %v535_v40, %s1455_s3  ;;  %v551_v42 = vrot.slane %v535_v40, 4  ;;  %v652_v3 = vsel %vm2190_vm7, 0.0, %v1435_v2  ;;  %v654_v10 = vsel %vm2190_vm7, 0.0, %v1434_v9  ;;  %765 = vmatpush.msra.mxu3 %v743_v37  ;;  %v781_v40 = vld [vmem:[%s2165_s10 + $0x48] sm:$0xff]  ;;  %v1444_v37 = vld [vmem:[%s2163_s9] ss:$0 sm:$0xff] }
 0x22f   :  { %v522_v43 = vpop.f32.mrf.mxu1  ;;  %v1768_v44 = vsel %vm2191_vm15, %v549_v41, %v551_v42  ;;  %v780_v41 = vld [vmem:[%s2165_s10 + $0x40] sm:$0xff] }
 0x230   :  { %v523_v45 = vadd.f32 %v1442_v24, %v522_v43  ;;  %v605_v46 = vsel %vm2186_vm14, %v1768_v44, 0.0  ;;  %v591_v56 = vrot.slane %v1768_v44, 4  ;;  %vm1815_vm14 = vcmp.ge.s32.totalorder %v107_v17, 12  ;;  %v778_v43 = vld [vmem:[%s2165_s10 + $0x30] sm:$0xff] }
 0x231   :  { %631 = vrot.lane.b32.xlu1 %v605_v46, %s1450_s30  ;;  %v571_v22 = vsel %vm1815_vm14, %v1768_v44, 0.0  ;;  %v777_v44 = vld [vmem:[%s2165_s10 + $0x28] sm:$0xff]  ;;  %v1443_v46 = vld [vmem:[%s2207_s2] ss:$0 sm:$0xff] }
 0x232   :  { %vm528_vm8 = vcmp.ge.f32.partialorder %v523_v45, 0.0  ;;  %v532_v47 = vmul.f32 0.2, %v523_v45 }
 0x234   :  { %v536_v48 = vsel %vm528_vm8, %v523_v45, %v532_v47  ;;  %vm668_vm8 = vcmask 392192   ;;  %v776_v45 = vld [vmem:[%s2165_s10 + $0x20] sm:$0xff]  ;;  %v775_v47 = vld [vmem:[%s2165_s10 + $0x18] sm:$0xff] }
 0x235   :  { %v553_v49 = vrot.slane %v536_v48, 4  ;;  %639 = vrot.lane.b32.xlu2 %v533_v29, %s1455_s3 }
 0x237   :  { %v554_v51 = vsel %vm2191_vm15, %v551_v42, %v553_v49  ;;  %v779_v42 = vld [vmem:[%s2165_s10 + $0x38] sm:$0xff] }
 0x238   :  { %633 = vrot.lane.b32.xlu0 %v554_v51, %s1450_s30  ;;  %v593_v54 = vrot.slane %v554_v51, 4  ;;  %v773_v51 = vld [vmem:[%s2165_s10 + $0x8] sm:$0xff] }
 0x239   :  { %645 = vrot.lane.b32.xlu1 %v536_v48, %s1455_s3  ;;  %v774_v48 = vld [vmem:[%s2165_s10 + $0x10] sm:$0xff] }
 0x23a   :  { %v594_v57 = vsel %vm2191_vm15, %v591_v56, %v593_v54  ;;  %v772_v54 = vld [vmem:[%s2165_s10] sm:$0xff] }
 0x23d   :  { %613 = vrot.lane.b32.xlu2 %v590_v55, %s1454_s29 }
 0x240   :  { %629 = vrot.lane.b32.xlu0 %v550_v50, %s1450_s30 }
 0x241   :  { %617 = vrot.lane.b32.xlu1 %v594_v57, %s1454_s29  ;;  %v818_v57 = vld [vmem:[%s2166_s12 + $0x18] sm:$0xff] }
 0x242   :  { %861 = vmatpush.msra.mxu0 %v818_v57 }
 0x244   :  { %862 = vmatpush.msra.mxu0 %v817_v58 }
 0x249   :  { %641 = vrot.lane.b32.xlu1 %v534_v38, %s1455_s3  ;;  %v742_v38 = vld [vmem:[%s2164_s8] sm:$0xff] }
 0x24a   :  { %766 = vmatpush.msra.mxu3 %v742_v38 }
 0x24c   :  { %796 = vmatpush.msrb.mxu3 %v783_v32 }
 0x24e   :  { %797 = vmatpush.msrb.mxu3 %v782_v39  ;;  %v1445_v39 = vld [vmem:[%s2168_s11] ss:$0 sm:$0xff] }
 0x250   :  { %798 = vmatpush.msrb.mxu3 %v781_v40 }
 0x252   :  { %799 = vmatpush.msrb.mxu3 %v780_v41 }
 0x254   :  { %800 = vmatpush.msrb.mxu3 %v779_v42 }
 0x256   :  { %801 = vmatpush.msrb.mxu3 %v778_v43 }
 0x258   :  { %802 = vmatpush.msrb.mxu3 %v777_v44  ;;  %v1446_v44 = vld [vmem:[%s2170_s14] ss:$0 sm:$0xff]  ;;  %s1456_s14 = smov 48  }
 0x25a   :  { %803 = vmatpush.msrb.mxu3 %v776_v45 }
 0x25c   :  { %804 = vmatpush.msrb.mxu3 %v775_v47 }
 0x25e   :  { %805 = vmatpush.msrb.mxu3 %v774_v48 }
 0x260   :  { %806 = vmatpush.msrb.mxu3 %v773_v51 }
 0x262   :  { %807 = vmatpush.msrb.mxu3 %v772_v54  ;;  %v887_v54 = vld [vmem:[%s2171_s15 + $0x30] sm:$0xff] }
 0x287   :  { %v644_v1 = vpop.permute.xlu2 %643 }
 0x28f   :  { %v640_v5 = vpop.permute.xlu2 %639 }
 0x293   :  { %v628_v4 = vpop.permute.xlu0 %627 }
 0x294   :  { %v656_v6 = vsel %vm2189_vm10, %v652_v3, %v628_v4 }
 0x295   :  { %v661_v7 = vsel %vm2188_vm12, %v656_v6, %v640_v5 }
 0x296   :  { %1393 = vmatmul.msk.f32.vlgmr.msrb.gmra.mxu0 %vm668_vm8, %v661_v7 }
 0x297   :  { %v614_v29 = vpop.permute.xlu2 %613 }
 0x298   :  { %v653_v33 = vsel %vm2190_vm7, %v569_v31, %v614_v29  ;;  %v771_v29 = vld [vmem:[%s2167_s1] sm:$0x3] }
 0x299   :  { %v815_v31 = vld [vmem:[%s2166_s12] sm:$0xff] }
 0x2a3   :  { %v632_v11 = vpop.permute.xlu1 %631 }
 0x2a4   :  { %v658_v13 = vsel %vm2189_vm10, %v654_v10, %v632_v11 }
 0x2a5   :  { %v663_v14 = vsel %vm2188_vm12, %v658_v13, %v644_v1 }
 0x2a6   :  { %1395 = vmatmul.msk.f32.vlgmr.msra.gmra.mxu2 %vm668_vm8, %v663_v14 }
 0x2aa   :  { %v634_v19 = vpop.permute.xlu0 %633 }
 0x2ab   :  { %v646_v16 = vpop.permute.xlu1 %645 }
 0x2b2   :  { %v630_v30 = vpop.permute.xlu0 %629 }
 0x2b3   :  { %v618_v24 = vpop.permute.xlu1 %617  ;;  %v657_v34 = vsel %vm2189_vm10, %v653_v33, %v630_v30  ;;  %v816_v30 = vld [vmem:[%s2166_s12 + $0x8] sm:$0xff]  ;;  %v822_v33 = vld [vmem:[%s2169_s13 + $0x18] sm:$0xff] }
 0x2b4   :  { %v655_v26 = vsel %vm2190_vm7, %v571_v22, %v618_v24  ;;  %863 = vmatpush.msra.mxu0 %v816_v30 }
 0x2b5   :  { %v659_v27 = vsel %vm2189_vm10, %v655_v26, %v634_v19 }
 0x2b6   :  { %v664_v8 = vsel %vm2188_vm12, %v659_v27, %v646_v16  ;;  %864 = vmatpush.msra.mxu0 %v815_v31 }
 0x2b7   :  { %1396 = vmatmul.msk.f32.gmra.mxu2 %vm668_vm8, %v664_v8 }
 0x2bb   :  { %v642_v35 = vpop.permute.xlu1 %641 }
 0x2bc   :  { %v662_v36 = vsel %vm2188_vm12, %v657_v34, %v642_v35  ;;  %v821_v34 = vld [vmem:[%s2169_s13 + $0x10] sm:$0xff]  ;;  %v820_v35 = vld [vmem:[%s2169_s13 + $0x8] sm:$0xff] }
 0x2bd   :  { %1394 = vmatmul.msk.f32.gmra.mxu0 %vm668_vm8, %v662_v36  ;;  %v819_v36 = vld [vmem:[%s2169_s13] sm:$0xff] }
 0x313   :  { %v698_v49 = vpop.f32.mrf.mxu0 }
 0x314   :  { %v699_v52 = vadd.f32 %v1443_v46, %v698_v49 }
 0x316   :  { %v714_v55 = vmul.f32 0.2, %v699_v52  ;;  %vm710_vm12 = vcmp.ge.f32.partialorder %v699_v52, 0.0 }
 0x318   :  { %v718_v63 = vsel %vm710_vm12, %v699_v52, %v714_v55 }
 0x319   :  { %v722_v5 = vsel %vm273_vm9, %v718_v63, -inf }
 0x329   :  { %v704_v50 = vpop.f32.mrf.mxu2 }
 0x32a   :  { %v705_v53 = vadd.f32 %v1443_v46, %v704_v50 }
 0x32c   :  { %v716_v56 = vmul.f32 0.2, %v705_v53  ;;  %vm712_vm10 = vcmp.ge.f32.partialorder %v705_v53, 0.0 }
 0x32e   :  { %v720_v0 = vsel %vm712_vm10, %v705_v53, %v716_v56  ;;  %vm740_vm10 = vcmask 1040384   ;;  %v888_v53 = vld [vmem:[%s2171_s15 + $0x38] sm:$0xff] }
 0x32f   :  { %v731_v6 = vsel %vm273_vm9, %v720_v0, -inf  ;;  %1013 = vmatpush.msrb.mxu1 %v888_v53 }
 0x331   :  { %1014 = vmatpush.msrb.mxu1 %v887_v54 }
 0x33a   :  { %v701_v59 = vpop.f32.mrf.mxu0  ;;  %v707_v60 = vpop.f32.mrf.mxu2 }
 0x33b   :  { %v702_v61 = vadd.f32 %v1443_v46, %v701_v59  ;;  %v708_v62 = vadd.f32 %v1443_v46, %v707_v60 }
 0x33d   :  { %vm711_vm7 = vcmp.ge.f32.partialorder %v702_v61, 0.0  ;;  %v715_v1 = vmul.f32 0.2, %v702_v61  ;;  %vm713_vm15 = vcmp.ge.f32.partialorder %v708_v62, 0.0  ;;  %v717_v2 = vmul.f32 0.2, %v708_v62 }
 0x33f   :  { %v719_v3 = vsel %vm711_vm7, %v702_v61, %v715_v1  ;;  %v721_v4 = vsel %vm713_vm15, %v708_v62, %v717_v2  ;;  %vm788_vm15 = vcmask 785408  }
 0x340   :  { %v723_v7 = vsel %vm273_vm9, %v719_v3, -inf  ;;  %v732_v9 = vsel %vm273_vm9, %v721_v4, -inf }
 0x341   :  { %v724_v10 = vmax.f32 %v722_v5, %v723_v7  ;;  %v733_v11 = vmax.f32 %v731_v6, %v732_v9 }
 0x343   :  { %v725_v13 = vrot.slane %v724_v10, 4  ;;  %v734_v14 = vrot.slane %v733_v11, 4 }
 0x345   :  { %v726_v15 = vmax.f32 %v724_v10, %v725_v13  ;;  %v735_v16 = vmax.f32 %v733_v11, %v734_v14 }
 0x347   :  { %v727_v17 = vrot.slane %v726_v15, 2  ;;  %v736_v18 = vrot.slane %v735_v16, 2 }
 0x349   :  { %v728_v19 = vmax.f32 %v726_v15, %v727_v17  ;;  %v737_v21 = vmax.f32 %v735_v16, %v736_v18  ;;  %v886_v15 = vld [vmem:[%s2171_s15 + $0x28] sm:$0xff]  ;;  %v885_v16 = vld [vmem:[%s2171_s15 + $0x20] sm:$0xff]  ;;  %v884_v17 = vld [vmem:[%s2171_s15 + $0x18] sm:$0xff] }
 0x34a   :  { %1015 = vmatpush.msrb.mxu1 %v886_v15  ;;  %v883_v18 = vld [vmem:[%s2171_s15 + $0x10] sm:$0xff] }
 0x34b   :  { %v729_v22 = vrot.slane %v728_v19, 1  ;;  %v738_v24 = vrot.slane %v737_v21, 1 }
 0x34c   :  { %1016 = vmatpush.msrb.mxu1 %v885_v16 }
 0x34d   :  { %v730_v26 = vmax.f32 %v728_v19, %v729_v22  ;;  %v739_v27 = vmax.f32 %v737_v21, %v738_v24  ;;  %v882_v19 = vld [vmem:[%s2171_s15 + $0x8] sm:$0xff]  ;;  %v881_v21 = vld [vmem:[%s2171_s15] sm:$0xff] }
 0x34e   :  { %1017 = vmatpush.msrb.mxu1 %v884_v17 }
 0x34f   :  { %v741_v8 = vsel %vm740_vm10, %v730_v26, %v739_v27 }
 0x350   :  { %1397 = vmatmul.msk.f32.vlgmr.msra.gmra.mxu3 %vm273_vm9, %v741_v8  ;;  %1018 = vmatpush.msrb.mxu1 %v883_v18 }
 0x351   :  { %838 = vmatpush.msra.mxu3 %v822_v33 }
 0x352   :  { %1019 = vmatpush.msrb.mxu1 %v882_v19 }
 0x353   :  { %839 = vmatpush.msra.mxu3 %v821_v34 }
 0x354   :  { %1020 = vmatpush.msrb.mxu1 %v881_v21 }
 0x355   :  { %840 = vmatpush.msra.mxu3 %v820_v35 }
 0x357   :  { %841 = vmatpush.msra.mxu3 %v819_v36 }
 0x358   :  { %1398 = vmatmul.msk.f32.vlgmr.msrb.gmra.mxu3 %vm788_vm15, %v771_v29  ;;  %vm2210_vm15 = vcmask 1043456  }
 0x3d3   :  { %v768_v38 = vpop.f32.mrf.mxu3 }
 0x3d4   :  { %v769_v32 = vadd.f32 %v1444_v37, %v768_v38 }
 0x3d6   :  { %1400 = vmatmul.msk.f32.vlgmr.msra.gmra.mxu0 %vm286_vm11, %v769_v32 }
 0x3db   :  { %v809_v40 = vpop.f32.mrf.mxu3 }
 0x3dc   :  { %v810_v41 = vadd.f32 %v1445_v39, %v809_v40 }
 0x3de   :  { %vm812_vm7 = vcmp.ge.f32.partialorder %v810_v41, 0.0  ;;  %v813_v42 = vmul.f32 0.2, %v810_v41 }
 0x3e0   :  { %v814_v43 = vsel %vm812_vm7, %v810_v41, %v813_v42 }
 0x3e1   :  { %1399 = vmatmul.msk.f32.vlgmr.msra.gmra.mxu3 %vm286_vm11, %v814_v43 }
 0x453   :  { %v866_v45 = vpop.f32.mrf.mxu0 }
 0x464   :  { %v843_v46 = vpop.f32.mrf.mxu3 }
 0x465   :  { %v867_v47 = vadd.f32 %v866_v45, %v843_v46 }
 0x467   :  { %v873_v48 = vadd.f32 %v1446_v44, %v867_v47 }
 0x469   :  { %vm874_vm12 = vcmp.ge.f32.partialorder %v873_v48, 0.0  ;;  %v875_v49 = vmul.f32 0.2, %v873_v48 }
 0x46b   :  { %v876_v50 = vsel %vm874_vm12, %v873_v48, %v875_v49  ;;  %v1447_v48 = vld [vmem:[%s2172_s16] ss:$0 sm:$0xff]  ;;  %vm2211_vm12 = vcmp.ge.s32.totalorder %v1588_v12, 4 }
 0x46c   :  { %v877_v51 = vperm.slane %v876_v50, 0  ;;  %v878_v52 = vperm.slane %v876_v50, 1 }
 0x46e   :  { %v1931_v55 = vrot.slane %v878_v52, 5  ;;  %971 = vrot.lane.b32.xlu1 %v877_v51, %s1456_s14  ;;  %v890_v56 = vrot.slane %v877_v51, 5 }
 0x470   :  { %v899_v57 = vsel %vm134_vm0, 0.0, %v890_v56  ;;  %v923_v58 = vrot.slane %v890_v56, 2  ;;  %v906_v59 = vrot.slane %v890_v56, 1  ;;  %v893_v60 = vsel %vm134_vm0, %v890_v56, %v1931_v55 }
 0x471   :  { %v922_v61 = vrot.slane %v899_v57, 2  ;;  %v905_v62 = vrot.slane %v899_v57, 1  ;;  %v908_v63 = vrot.slane %v893_v60, 1  ;;  %v910_v0 = vrot.slane %v1931_v55, 1 }
 0x472   :  { %v925_v7 = vrot.slane %v893_v60, 2  ;;  %v927_v11 = vrot.slane %v1931_v55, 2  ;;  %vm2208_vm0 = vcmp.ge.s32.totalorder %v1588_v12, 3 }
 0x473   :  { %v924_v1 = vsel %vm206_vm3, %v922_v61, %v923_v58  ;;  %v907_v2 = vsel %vm176_vm1, %v905_v62, %v906_v59  ;;  %v911_v3 = vsel %vm176_vm1, %v908_v63, %v910_v0  ;;  %v909_v10 = vsel %vm176_vm1, %v906_v59, %v908_v63 }
 0x474   :  { %v935_v4 = vsel %vm194_vm4, %v924_v1, 0.0  ;;  %v918_v5 = vsel %vm163_vm2, %v907_v2, 0.0  ;;  %v920_v6 = vsel %vm165_vm6, %v911_v3, 0.0  ;;  %v926_v9 = vsel %vm206_vm3, %v923_v58, %v925_v7 }
 0x475   :  { %959 = vrot.lane.b32.xlu0 %v935_v4, %s1457_s5  ;;  %943 = vrot.lane.b32.xlu2 %v918_v5, %s1452_s22  ;;  %v928_v13 = vsel %vm206_vm3, %v925_v7, %v927_v11  ;;  %v900_v24 = vsel %vm2208_vm0, %v899_v57, 0.0  ;;  %vm992_vm1 = vcmask 523264   ;;  %vm2209_vm4 = vcmp.ge.s32.totalorder %v1606_v25, 3  ;;  %vm2212_vm0 = vmmov %vm2210_vm15 }
 0x476   :  { %947 = vrot.lane.b32.xlu1 %v920_v6, %s1452_s22  ;;  %v937_v14 = vsel %vm196_vm5, %v928_v13, 0.0  ;;  %v902_v38 = vsel %vm2209_vm4, %v893_v60, 0.0  ;;  %vm2214_vm4 = vcmp.ge.s32.totalorder %v1606_v25, 4 }
 0x47d   :  { %961 = vrot.lane.b32.xlu0 %v926_v9, %s1457_s5  ;;  %945 = vrot.lane.b32.xlu2 %v909_v10, %s1452_s22 }
 0x47e   :  { %949 = vrot.lane.b32.xlu1 %v910_v0, %s1452_s22 }
 0x485   :  { %973 = vrot.lane.b32.xlu0 %v878_v52, %s1456_s14  ;;  %963 = vrot.lane.b32.xlu2 %v937_v14, %s1457_s5 }
 0x48d   :  { %965 = vrot.lane.b32.xlu2 %v927_v11, %s1457_s5 }
 0x4cf   :  { %v944_v22 = vpop.permute.xlu2 %943 }
 0x4d0   :  { %v977_v27 = vsel %vm273_vm9, %v900_v24, %v944_v22 }
 0x4d7   :  { %v946_v31 = vpop.permute.xlu2 %945 }
 0x4d8   :  { %v978_v33 = vsel %vm273_vm9, %v890_v56, %v946_v31 }
 0x4df   :  { %v964_v39 = vpop.permute.xlu2 %963 }
 0x4e0   :  { %v972_v26 = vpop.permute.xlu1 %971 }
 0x4e7   :  { %v960_v8 = vpop.permute.xlu0 %959  ;;  %v966_v45 = vpop.permute.xlu2 %965 }
 0x4e8   :  { %v981_v29 = vsel %vm286_vm11, %v977_v27, %v960_v8  ;;  %v948_v35 = vpop.permute.xlu1 %947 }
 0x4e9   :  { %v985_v30 = vsel %vm668_vm8, %v981_v29, %v972_v26  ;;  %v979_v32 = vsel %vm273_vm9, %v902_v38, %v948_v35  ;;  %v1050_v38 = vld [vmem:[%s2174_s17 + $0x20] sm:$0xff] }
 0x4ea   :  { %1401 = vmatmul.msk.f32.vlgmr.msrb.gmra.mxu1 %vm992_vm1, %v985_v30  ;;  %v983_v41 = vsel %vm286_vm11, %v979_v32, %v964_v39  ;;  %v1049_v32 = vld [vmem:[%s2174_s17 + $0x18] sm:$0xff]  ;;  %v1048_v39 = vld [vmem:[%s2174_s17 + $0x10] sm:$0xff] }
 0x4ef   :  { %v962_v34 = vpop.permute.xlu0 %961 }
 0x4f0   :  { %v982_v36 = vsel %vm286_vm11, %v978_v33, %v962_v34  ;;  %v950_v43 = vpop.permute.xlu1 %949 }
 0x4f1   :  { %v986_v37 = vsel %vm668_vm8, %v982_v36, %v972_v26  ;;  %v980_v44 = vsel %vm273_vm9, %v1931_v55, %v950_v43 }
 0x4f2   :  { %1402 = vmatmul.msk.f32.gmra.mxu1 %vm992_vm1, %v986_v37  ;;  %v984_v46 = vsel %vm286_vm11, %v980_v44, %v966_v45  ;;  %v1051_v37 = vld [vmem:[%s2174_s17 + $0x28] sm:$0xff] }
 0x4f3   :  { %1189 = vmatpush.msrb.mxu2 %v1051_v37 }
 0x4f5   :  { %1190 = vmatpush.msrb.mxu2 %v1050_v38 }
 0x4f7   :  { %v974_v40 = vpop.permute.xlu0 %973  ;;  %1191 = vmatpush.msrb.mxu2 %v1049_v32 }
 0x4f8   :  { %v987_v42 = vsel %vm668_vm8, %v983_v41, %v974_v40  ;;  %v988_v47 = vsel %vm668_vm8, %v984_v46, %v974_v40  ;;  %v1047_v40 = vld [vmem:[%s2174_s17 + $0x8] sm:$0xff]  ;;  %v1046_v41 = vld [vmem:[%s2174_s17] sm:$0xff] }
 0x4f9   :  { %1192 = vmatpush.msrb.mxu2 %v1048_v39 }
 0x4fa   :  { %1403 = vmatmul.msk.f32.gmra.mxu1 %vm992_vm1, %v987_v42 }
 0x4fb   :  { %1193 = vmatpush.msrb.mxu2 %v1047_v40 }
 0x4fd   :  { %1194 = vmatpush.msrb.mxu2 %v1046_v41  ;;  %v1221_v41 = vld [vmem:[%s2176_s19 + $0x8] sm:$0xff] }
 0x502   :  { %1404 = vmatmul.msk.f32.gmra.mxu1 %vm992_vm1, %v988_v47  ;;  %vm2213_vm1 = vmmov %vm2212_vm0 }
 0x567   :  { %v1022_v49 = vpop.f32.mrf.mxu1 }
 0x568   :  { %v1023_v50 = vadd.f32 %v1447_v48, %v1022_v49 }
 0x56a   :  { %v1038_v51 = vmul.f32 0.2, %v1023_v50  ;;  %vm1034_vm5 = vcmp.ge.f32.partialorder %v1023_v50, 0.0 }
 0x56c   :  { %v1042_v52 = vsel %vm1034_vm5, %v1023_v50, %v1038_v51  ;;  %vm2215_vm5 = vmmov %vm2212_vm0 }
 0x56d   :  { %1140 = vrot.lane.b32.xlu2 %v1042_v52, %s1455_s3  ;;  %v1057_v54 = vrot.slane %v1042_v52, 2 }
 0x56f   :  { %v1025_v53 = vpop.f32.mrf.mxu1  ;;  %v2002_v57 = vsel %vm206_vm3, 0.0, %v1057_v54 }
 0x570   :  { %v1026_v55 = vadd.f32 %v1447_v48, %v1025_v53  ;;  %v1074_v60 = vrot.slane %v2002_v57, 2  ;;  %v1091_v63 = vrot.slane %v2002_v57, 4 }
 0x572   :  { %v1039_v56 = vmul.f32 0.2, %v1026_v55  ;;  %vm1035_vm10 = vcmp.ge.f32.partialorder %v1026_v55, 0.0 }
 0x574   :  { %v1043_v58 = vsel %vm1035_vm10, %v1026_v55, %v1039_v56  ;;  %vm2218_vm10 = vcmask 195584  }
 0x575   :  { %1142 = vrot.lane.b32.xlu2 %v1043_v58, %s1455_s3  ;;  %v1058_v59 = vrot.slane %v1043_v58, 2 }
 0x577   :  { %v2007_v61 = vsel %vm206_vm3, %v1057_v54, %v1058_v59  ;;  %v1028_v62 = vpop.f32.mrf.mxu1 }
 0x578   :  { %v1029_v0 = vadd.f32 %v1447_v48, %v1028_v62  ;;  %v1092_v1 = vrot.slane %v2007_v61, 4  ;;  %v1075_v2 = vrot.slane %v2007_v61, 2 }
 0x57a   :  { %v1040_v3 = vmul.f32 0.2, %v1029_v0  ;;  %v1093_v4 = vsel %vm2210_vm15, %v1091_v63, %v1092_v1  ;;  %v1076_v5 = vsel %vm206_vm3, %v1074_v60, %v1075_v2  ;;  %vm1036_vm7 = vcmp.ge.f32.partialorder %v1029_v0, 0.0 }
 0x57b   :  { %v1104_v6 = vsel %vm163_vm2, %v1093_v4, 0.0  ;;  %v1087_v7 = vsel %vm2211_vm12, %v1076_v5, 0.0  ;;  %vm2219_vm15 = vcmask 293888   ;;  %vm2221_vm12 = vmmov %vm2218_vm10  ;;  %v1448_v4 = vld [vmem:[%s2173_s18] ss:$0 sm:$0xff] }
 0x57c   :  { %1128 = vrot.lane.b32.xlu1 %v1104_v6, %s1450_s30  ;;  %1112 = vrot.lane.b32.xlu0 %v1087_v7, %s1454_s29  ;;  %v1044_v9 = vsel %vm1036_vm7, %v1029_v0, %v1040_v3 }
 0x57d   :  { %1144 = vrot.lane.b32.xlu2 %v1044_v9, %s1455_s3  ;;  %v1060_v10 = vrot.slane %v1044_v9, 2 }
 0x57f   :  { %v1061_v11 = vsel %vm206_vm3, %v1058_v59, %v1060_v10  ;;  %v1031_v13 = vpop.f32.mrf.mxu1 }
 0x580   :  { %v1032_v14 = vadd.f32 %v1447_v48, %v1031_v13  ;;  %v1094_v15 = vrot.slane %v1061_v11, 4  ;;  %v1077_v16 = vrot.slane %v1061_v11, 2 }
 0x582   :  { %v1041_v17 = vmul.f32 0.2, %v1032_v14  ;;  %v1095_v18 = vsel %vm2212_vm0, %v1092_v1, %v1094_v15  ;;  %v1078_v19 = vsel %vm206_vm3, %v1075_v2, %v1077_v16  ;;  %vm1037_vm2 = vcmp.ge.f32.partialorder %v1032_v14, 0.0  ;;  %vm2222_vm0 = vmmov %vm2219_vm15 }
 0x584   :  { %1130 = vrot.lane.b32.xlu1 %v1095_v18, %s1450_s30  ;;  %1114 = vrot.lane.b32.xlu0 %v1078_v19, %s1454_s29  ;;  %v1045_v21 = vsel %vm1037_vm2, %v1032_v14, %v1041_v17  ;;  %vm2223_vm2 = vcmp.ge.s32.totalorder %v1606_v25, 6 }
 0x585   :  { %v1062_v22 = vrot.slane %v1045_v21, 2  ;;  %1146 = vrot.lane.b32.xlu2 %v1045_v21, %s1455_s3  ;;  %v1071_v58 = vsel %vm2223_vm2, %v1061_v11, 0.0 }
 0x587   :  { %v1063_v24 = vsel %vm206_vm3, %v1060_v10, %v1062_v22  ;;  %v1098_v33 = vrot.slane %v1062_v22, 4  ;;  %v1081_v34 = vrot.slane %v1062_v22, 2 }
 0x588   :  { %v1096_v26 = vrot.slane %v1063_v24, 4  ;;  %v1079_v27 = vrot.slane %v1063_v24, 2 }
 0x58a   :  { %v1097_v8 = vsel %vm2213_vm1, %v1094_v15, %v1096_v26  ;;  %v1080_v29 = vsel %vm206_vm3, %v1077_v16, %v1079_v27  ;;  %v1099_v35 = vsel %vm2215_vm5, %v1096_v26, %v1098_v33  ;;  %v1082_v36 = vsel %vm206_vm3, %v1079_v27, %v1081_v34  ;;  %vm2226_vm5 = vmmov %vm2222_vm0 }
 0x58b   :  { %v1106_v30 = vsel %vm165_vm6, %v1097_v8, 0.0  ;;  %v1089_v31 = vsel %vm2214_vm4, %v1080_v29, 0.0  ;;  %vm2216_vm3 = vcmp.ge.s32.totalorder %v1588_v12, 6  ;;  %vm2217_vm6 = vcmask 97280   ;;  %vm2225_vm4 = vmmov %vm2218_vm10 }
 0x58c   :  { %1132 = vrot.lane.b32.xlu1 %v1106_v30, %s1450_s30  ;;  %1116 = vrot.lane.b32.xlu0 %v1089_v31, %s1454_s29  ;;  %v1069_v44 = vsel %vm2216_vm3, %v2002_v57, 0.0  ;;  %vm2220_vm7 = vmmov %vm2217_vm6 }
 0x58d   :  { %vm2224_vm1 = vmmov %vm2217_vm6 }
 0x58e   :  { %vm2227_vm3 = vmmov %vm2224_vm1 }
 0x594   :  { %1134 = vrot.lane.b32.xlu1 %v1099_v35, %s1450_s30  ;;  %1118 = vrot.lane.b32.xlu0 %v1082_v36, %s1454_s29 }
 0x5c7   :  { %v1141_v42 = vpop.permute.xlu2 %1140 }
 0x5cf   :  { %v1143_v49 = vpop.permute.xlu2 %1142 }
 0x5d7   :  { %v1145_v55 = vpop.permute.xlu2 %1144 }
 0x5df   :  { %v1147_v1 = vpop.permute.xlu2 %1146 }
 0x5ee   :  { %v1129_v43 = vpop.permute.xlu1 %1128  ;;  %v1113_v45 = vpop.permute.xlu0 %1112 }
 0x5ef   :  { %v1152_v46 = vsel %vm2217_vm6, %v1069_v44, %v1113_v45  ;;  %vm2228_vm6 = vmmov %vm2225_vm4 }
 0x5f0   :  { %v1156_v47 = vsel %vm2218_vm10, %v1152_v46, %v1129_v43  ;;  %vm2229_vm10 = vmmov %vm2222_vm0 }
 0x5f1   :  { %v1160_v48 = vsel %vm2219_vm15, %v1156_v47, %v1141_v42  ;;  %v1220_v42 = vld [vmem:[%s2176_s19] sm:$0xff] }
 0x5f2   :  { %1405 = vmatmul.msk.f32.vlgmr.msrb.gmra.mxu2 %vm668_vm8, %v1160_v48 }
 0x5f6   :  { %v1131_v50 = vpop.permute.xlu1 %1130  ;;  %v1115_v51 = vpop.permute.xlu0 %1114 }
 0x5f7   :  { %v1153_v52 = vsel %vm2220_vm7, %v2007_v61, %v1115_v51 }
 0x5f8   :  { %v1157_v53 = vsel %vm2221_vm12, %v1153_v52, %v1131_v50  ;;  %vm2230_vm12 = vcmask 1043456  }
 0x5f9   :  { %v1161_v54 = vsel %vm2222_vm0, %v1157_v53, %v1143_v49 }
 0x5fa   :  { %1406 = vmatmul.msk.f32.gmra.mxu2 %vm668_vm8, %v1161_v54 }
 0x5fe   :  { %v1133_v56 = vpop.permute.xlu1 %1132  ;;  %v1117_v57 = vpop.permute.xlu0 %1116 }
 0x5ff   :  { %v1154_v59 = vsel %vm2224_vm1, %v1071_v58, %v1117_v57 }
 0x600   :  { %v1158_v60 = vsel %vm2225_vm4, %v1154_v59, %v1133_v56  ;;  %vm2234_vm4 = vcmp.ge.s32.totalorder %v1606_v25, 4 }
 0x601   :  { %v1162_v62 = vsel %vm2226_vm5, %v1158_v60, %v1145_v55 }
 0x602   :  { %1407 = vmatmul.msk.f32.gmra.mxu2 %vm668_vm8, %v1162_v62 }
 0x606   :  { %v1135_v61 = vpop.permute.xlu1 %1134  ;;  %v1119_v63 = vpop.permute.xlu0 %1118 }
 0x607   :  { %v1155_v0 = vsel %vm2227_vm3, %v1063_v24, %v1119_v63 }
 0x608   :  { %v1159_v2 = vsel %vm2228_vm6, %v1155_v0, %v1135_v61  ;;  %vm2236_vm6 = vcmp.ge.s32.totalorder %v1588_v12, 4  ;;  %v1222_v12 = vld [vmem:[%s2176_s19 + $0x10] sm:$0xff] }
 0x609   :  { %v1163_v3 = vsel %vm2229_vm10, %v1159_v2, %v1147_v1 }
 0x60a   :  { %1408 = vmatmul.msk.f32.gmra.mxu2 %vm668_vm8, %v1163_v3  ;;  %vm2231_vm8 = vmmov %vm2230_vm12 }
 0x60b   :  { %vm2232_vm0 = vmmov %vm2231_vm8 }
 0x60c   :  { %vm2233_vm1 = vmmov %vm2232_vm0 }
 0x60d   :  { %vm2235_vm3 = vmmov %vm2232_vm0 }
 0x60e   :  { %vm2237_vm10 = vmmov %vm2232_vm0 }
 0x675   :  { %v1196_v5 = vpop.f32.mrf.mxu2 }
 0x676   :  { %v1197_v6 = vadd.f32 %v1448_v4, %v1196_v5 }
 0x678   :  { %v1212_v7 = vmul.f32 0.2, %v1197_v6  ;;  %vm1208_vm15 = vcmp.ge.f32.partialorder %v1197_v6, 0.0 }
 0x67a   :  { %v1216_v9 = vsel %vm1208_vm15, %v1197_v6, %v1212_v7  ;;  %vm2238_vm15 = vcmask 64512  }
 0x67b   :  { %v1229_v13 = vrot.slane %v1216_v9, 4 }
 0x67d   :  { %v1199_v10 = vpop.f32.mrf.mxu2  ;;  %v1240_v16 = vsel %vm2230_vm12, 0.0, %v1229_v13  ;;  %vm2240_vm12 = vmmov %vm2238_vm15 }
 0x67e   :  { %v1200_v11 = vadd.f32 %v1448_v4, %v1199_v10  ;;  %v1245_v24 = vrot.slane %v1240_v16, 4  ;;  %v1261_v39 = vsel %vm2236_vm6, %v1240_v16, 0.0  ;;  %v1241_v44 = vsel %vm1824_vm13, %v1240_v16, 0.0  ;;  %vm2242_vm13 = vmmov %vm2240_vm12 }
 0x680   :  { %v1213_v14 = vmul.f32 0.2, %v1200_v11  ;;  %vm1209_vm7 = vcmp.ge.f32.partialorder %v1200_v11, 0.0 }
 0x682   :  { %v1217_v15 = vsel %vm1209_vm7, %v1200_v11, %v1213_v14  ;;  %vm2239_vm7 = vcmask 195584  }
 0x683   :  { %1299 = vrot.lane.b32.xlu2 %v1217_v15, %s1450_s30  ;;  %v1230_v17 = vrot.slane %v1217_v15, 4 }
 0x685   :  { %v1202_v18 = vpop.f32.mrf.mxu2  ;;  %v1231_v19 = vsel %vm2231_vm8, %v1229_v13, %v1230_v17  ;;  %vm2241_vm8 = vmmov %vm2239_vm7 }
 0x686   :  { %v1203_v21 = vadd.f32 %v1448_v4, %v1202_v18  ;;  %1287 = vrot.lane.b32.xlu1 %v1231_v19, %s1452_s22  ;;  %v1247_v22 = vrot.slane %v1231_v19, 4 }
 0x688   :  { %v1214_v26 = vmul.f32 0.2, %v1203_v21  ;;  %v1248_v27 = vsel %vm2232_vm0, %v1245_v24, %v1247_v22  ;;  %vm1210_vm2 = vcmp.ge.f32.partialorder %v1203_v21, 0.0  ;;  %vm2243_vm0 = vmmov %vm2240_vm12 }
 0x689   :  { %1271 = vrot.lane.b32.xlu0 %v1248_v27, %s1451_s7  ;;  %vm2248_vm6 = vmmov %vm2243_vm0 }
 0x68a   :  { %v1218_v8 = vsel %vm1210_vm2, %v1203_v21, %v1214_v26  ;;  %vm2244_vm2 = vmmov %vm2239_vm7 }
 0x68b   :  { %1301 = vrot.lane.b32.xlu2 %v1218_v8, %s1450_s30  ;;  %v1232_v29 = vrot.slane %v1218_v8, 4 }
 0x68d   :  { %v1205_v30 = vpop.f32.mrf.mxu2  ;;  %v1233_v31 = vsel %vm2233_vm1, %v1230_v17, %v1232_v29  ;;  %vm2245_vm1 = vmmov %vm2244_vm2 }
 0x68e   :  { %v1206_v33 = vadd.f32 %v1448_v4, %v1205_v30  ;;  %v1263_v34 = vsel %vm2234_vm4, %v1233_v31, 0.0  ;;  %v1249_v40 = vrot.slane %v1233_v31, 4  ;;  %v1243_v58 = vsel %vm1815_vm14, %v1233_v31, 0.0  ;;  %vm2246_vm4 = vmmov %vm2243_vm0 }
 0x68f   :  { %1289 = vrot.lane.b32.xlu1 %v1263_v34, %s1452_s22 }
 0x690   :  { %vm1211_vm5 = vcmp.ge.f32.partialorder %v1206_v33, 0.0  ;;  %v1215_v35 = vmul.f32 0.2, %v1206_v33 }
 0x691   :  { %1437 = vrot.lane.b32.xlu0 %v1453_v23, %s1451_s7  ;;  %v1223_v23 = vld [vmem:[%s2176_s19 + $0x18] sm:$0xff] }
 0x692   :  { %v1219_v36 = vsel %vm1211_vm5, %v1206_v33, %v1215_v35  ;;  %1348 = vmatpush.msra.mxu2 %v1223_v23  ;;  %1419 = vmatpush.msrb.mxu3 %v1223_v23 }
 0x693   :  { %v1234_v37 = vrot.slane %v1219_v36, 4 }
 0x694   :  { %1420 = vmatpush.msrb.mxu3 %v1222_v12  ;;  %1349 = vmatpush.msra.mxu2 %v1222_v12 }
 0x695   :  { %v1235_v38 = vsel %vm2235_vm3, %v1232_v29, %v1234_v37 }
 0x696   :  { %1291 = vrot.lane.b32.xlu2 %v1235_v38, %s1452_s22  ;;  %v1251_v32 = vrot.slane %v1235_v38, 4  ;;  %1421 = vmatpush.msrb.mxu3 %v1221_v41 }
 0x697   :  { %1285 = vrot.lane.b32.xlu1 %v1261_v39, %s1452_s22  ;;  %1350 = vmatpush.msra.mxu2 %v1221_v41 }
 0x698   :  { %v1252_v25 = vsel %vm2237_vm10, %v1249_v40, %v1251_v32  ;;  %1422 = vmatpush.msrb.mxu3 %v1220_v42  ;;  %vm2249_vm10 = vmmov %vm2243_vm0 }
 0x699   :  { %1275 = vrot.lane.b32.xlu0 %v1252_v25, %s1451_s7  ;;  %1351 = vmatpush.msra.mxu2 %v1220_v42 }
 0x69f   :  { %1303 = vrot.lane.b32.xlu1 %v1219_v36, %s1450_s30 }
 0x6a1   :  { %1297 = vrot.lane.b32.xlu0 %v1216_v9, %s1450_s30 }
 0x6dd   :  { %v1300_v47 = vpop.permute.xlu2 %1299 }
 0x6e5   :  { %v1302_v54 = vpop.permute.xlu2 %1301 }
 0x6f0   :  { %v1292_v62 = vpop.permute.xlu2 %1291 }
 0x6f8   :  { %v1288_v43 = vpop.permute.xlu1 %1287 }
 0x6fb   :  { %v1272_v45 = vpop.permute.xlu0 %1271 }
 0x6fc   :  { %v1310_v46 = vsel %vm2238_vm15, %v1241_v44, %v1272_v45 }
 0x6fd   :  { %v1314_v48 = vsel %vm273_vm9, %v1310_v46, %v1288_v43 }
 0x6fe   :  { %v1318_v49 = vsel %vm2239_vm7, %v1314_v48, %v1300_v47 }
 0x6ff   :  { %1410 = vmatmul.msk.f32.vlgmr.msrb.gmra.mxu3 %vm286_vm11, %v1318_v49 }
 0x701   :  { %v1290_v50 = vpop.permute.xlu1 %1289 }
 0x703   :  { %v1438_v51 = vpop.permute.xlu0 %1437 }
 0x704   :  { %v1439_v52 = vunpack.i.l.bf16 %v1438_v51  ;;  %v1440_v59 = vunpack.i.h.bf16 %v1438_v51 }
 0x706   :  { %v1311_v53 = vsel %vm2240_vm12, 0.0, %v1439_v52  ;;  %v1309_v0 = vsel %vm2243_vm0, 0.0, %v1440_v59 }
 0x707   :  { %v1315_v55 = vsel %vm273_vm9, %v1311_v53, %v1290_v50 }
 0x708   :  { %v1319_v28 = vsel %vm2241_vm8, %v1315_v55, %v1302_v54 }
 0x709   :  { %1411 = vmatmul.msk.f32.gmra.mxu3 %vm286_vm11, %v1319_v28  ;;  %v1286_v56 = vpop.permute.xlu1 %1285 }
 0x70a   :  { %v1313_v2 = vsel %vm273_vm9, %v1309_v0, %v1286_v56 }
 0x70b   :  { %v1276_v57 = vpop.permute.xlu0 %1275 }
 0x70c   :  { %v1312_v60 = vsel %vm2242_vm13, %v1243_v58, %v1276_v57 }
 0x70d   :  { %v1316_v63 = vsel %vm273_vm9, %v1312_v60, %v1292_v62 }
 0x711   :  { %v1304_v61 = vpop.permute.xlu1 %1303 }
 0x712   :  { %v1320_v1 = vsel %vm2244_vm2, %v1316_v63, %v1304_v61 }
 0x713   :  { %v1298_v3 = vpop.permute.xlu0 %1297  ;;  %1412 = vmatmul.msk.f32.gmra.mxu3 %vm286_vm11, %v1320_v1 }
 0x714   :  { %v1317_v4 = vsel %vm2245_vm1, %v1313_v2, %v1298_v3 }
 0x715   :  { %1409 = vmatmul.msk.f32.vlgmr.msra.gmra.mxu2 %vm286_vm11, %v1317_v4  ;;  %vm2247_vm11 = vmmov %vm2243_vm0 }
 0x782   :  { %v1356_v5 = vpop.f32.mrf.mxu3 }
 0x783   :  { %v1357_v6 = vadd.f32 %v1449_v20, %v1356_v5 }
 0x785   :  { %vm1366_vm14 = vcmp.ge.f32.partialorder %v1357_v6, 0.0  ;;  %v1370_v7 = vmul.f32 0.2, %v1357_v6 }
 0x787   :  { %v1374_v9 = vsel %vm1366_vm14, %v1357_v6, %v1370_v7 }
 0x788   :  { %1378 = vst.msk [vmem:[%s2177_s21 + $0x8] sm:$0xff] %vm2246_vm4, %v1374_v9 }
 0x78c   :  { %v1359_v10 = vpop.f32.mrf.mxu3 }
 0x78d   :  { %v1360_v11 = vadd.f32 %v1449_v20, %v1359_v10 }
 0x78f   :  { %vm1367_vm9 = vcmp.ge.f32.partialorder %v1360_v11, 0.0  ;;  %v1371_v13 = vmul.f32 0.2, %v1360_v11 }
 0x791   :  { %v1375_v14 = vsel %vm1367_vm9, %v1360_v11, %v1371_v13 }
 0x792   :  { %1379 = vst.msk [vmem:[%s2177_s21 + $0x10] sm:$0xff] %vm2247_vm11, %v1375_v14 }
 0x796   :  { %v1362_v15 = vpop.f32.mrf.mxu3 }
 0x797   :  { %v1363_v16 = vadd.f32 %v1449_v20, %v1362_v15 }
 0x798   :  { %v1353_v17 = vpop.f32.mrf.mxu2 }
 0x799   :  { %vm1368_vm5 = vcmp.ge.f32.partialorder %v1363_v16, 0.0  ;;  %v1372_v18 = vmul.f32 0.2, %v1363_v16  ;;  %v1354_v19 = vadd.f32 %v1449_v20, %v1353_v17 }
 0x79b   :  { %v1376_v21 = vsel %vm1368_vm5, %v1363_v16, %v1372_v18  ;;  %vm1365_vm3 = vcmp.ge.f32.partialorder %v1354_v19, 0.0  ;;  %v1369_v22 = vmul.f32 0.2, %v1354_v19 }
 0x79c   :  { %1380 = vst.msk [vmem:[%s2177_s21 + $0x18] sm:$0xff] %vm2248_vm6, %v1376_v21 }
 0x79d   :  { %v1373_v24 = vsel %vm1365_vm3, %v1354_v19, %v1369_v22 }
 0x79e   :  { %1377 = vst.msk [vmem:[%s2177_s21] sm:$0xff] %vm2249_vm10, %v1373_v24 }

</bundles_post_ra>
